<compile_context>
chip_gen: v7x
topology: tpu7x:2x2x1
jax: 0.10.0
libtpu: 0.0.40
codegen_flags: <defaults>
</compile_context>

<pallas_src>
import functools

import jax
import jax.numpy as jnp
from jax.experimental import pallas as pl
from jax.experimental.pallas import tpu as pltpu

BN_EPS = 1e-5            # PyTorch BatchNorm1d default
_LANE = 128


def _round_up(n, m):
    return ((n + m - 1) // m) * m


def _pad_axis(a, axis, target):
    pad = target - a.shape[axis]
    if pad == 0:
        return a
    widths = [(0, 0)] * a.ndim
    widths[axis] = (0, pad)
    return jnp.pad(a, widths)


def _pick_batch_tile(batch):
    # Largest 8-aligned tile that exactly divides the batch (bigger tiles -> fewer grid steps).
    for tb in (1024, 512, 256, 128, 64, 32, 16, 8):
        if tb <= batch and batch % tb == 0:
            return tb
    return batch  # fall back to a single full-batch tile


def prepare_params(w1, gamma, beta, w2, b2):
    """Pad (lane-dense) and cast the parameters ONCE, outside the per-call jit."""
    d_in, hid = w1.shape
    d_out = w2.shape[1]
    d_in_p, hid_p, d_out_p = (_round_up(d, _LANE) for d in (d_in, hid, d_out))
    w1_p = _pad_axis(_pad_axis(w1, 0, d_in_p), 1, hid_p).astype(jnp.bfloat16)
    w2_p = _pad_axis(_pad_axis(w2, 0, hid_p), 1, d_out_p).astype(jnp.bfloat16)
    gamma_p = _pad_axis(jnp.asarray(gamma, jnp.float32).reshape(1, hid), 1, hid_p)
    beta_p = _pad_axis(jnp.asarray(beta, jnp.float32).reshape(1, hid), 1, hid_p)
    b2_p = _pad_axis(jnp.asarray(b2, jnp.float32).reshape(1, d_out), 1, d_out_p)
    return w1_p, gamma_p, beta_p, w2_p, b2_p


# ---------------------------------------------------------------------------------------------
# Fused kernel: phase 0 = matmul1 + BN statistics (h cached in VMEM); phase 1 = folded BN +
# ReLU + matmul2 + bias.
# ---------------------------------------------------------------------------------------------
def _fused_kernel(x_ref, w1_ref, gamma_ref, beta_ref, w2_ref, b2_ref, o_ref,
                  h_ref, sum_ref, sumsq_ref, s_ref, t_ref, *, tb, inv_batch):
    p = pl.program_id(0)   # 0 = stats sweep, 1 = normalize + project
    i = pl.program_id(1)   # batch tile

    @pl.when((p == 0) & (i == 0))
    def _init():
        sum_ref[...] = jnp.zeros_like(sum_ref)
        sumsq_ref[...] = jnp.zeros_like(sumsq_ref)

    @pl.when(p == 0)
    def _stats():
        # bf16 x bf16 -> f32 accumulation on the MXU (x cast in-kernel, no wrapper round trip).
        h = jnp.dot(x_ref[...].astype(jnp.bfloat16), w1_ref[...],
                    preferred_element_type=jnp.float32)            # [tb, hid_p] f32
        row = pl.multiple_of(i * tb, tb)
        h_ref[pl.ds(row, tb), :] = h                               # cache for phase 1
        sum_ref[...] += jnp.sum(h, axis=0, keepdims=True)
        sumsq_ref[...] += jnp.sum(h * h, axis=0, keepdims=True)

    @pl.when((p == 1) & (i == 0))
    def _fold_bn():
        # Fold BN (training-mode batch stats, biased variance) into per-feature scale/shift.
        # E[h^2]-mean^2 in f32 is adequate for roughly zero-mean post-Linear activations.
        # TODO(synk): switch to a shifted / Welford accumulation if activations are far from
        # zero-mean and cancellation becomes a concern.
        mean = sum_ref[...] * inv_batch
        var = jnp.maximum(sumsq_ref[...] * inv_batch - mean * mean, 0.0)
        s = gamma_ref[...] * jax.lax.rsqrt(var + BN_EPS)           # EUP rsqrt
        s_ref[...] = s
        t_ref[...] = beta_ref[...] - mean * s

    @pl.when(p == 1)
    def _project():
        row = pl.multiple_of(i * tb, tb)
        h = h_ref[pl.ds(row, tb), :]
        h = jnp.maximum(h * s_ref[...] + t_ref[...], 0.0)          # folded BN + ReLU
        out = jnp.dot(h.astype(jnp.bfloat16), w2_ref[...],
                      preferred_element_type=jnp.float32)
        o_ref[...] = (out + b2_ref[...]).astype(o_ref.dtype)


@functools.partial(jax.jit, static_argnames=("d_out", "batch_tile"))
def projection_head_forward(x, w1_p, gamma_p, beta_p, w2_p, b2_p, *, d_out, batch_tile=None):
    """Fused forward of ProjectionHead([(D_IN, HID, BatchNorm1d, ReLU), (HID, D_OUT, None, None)]).

    Takes parameters already prepared by prepare_params() (padded, bf16 weights).
    """
    batch = x.shape[0]
    d_in_p, hid_p = w1_p.shape
    d_out_p = w2_p.shape[1]

    # x stays in its original dtype (bf16 cast happens in-kernel); pad only if needed.
    if x.shape[1] != d_in_p:
        x = _pad_axis(x, 1, d_in_p)

    tb = batch_tile if batch_tile is not None else _pick_batch_tile(batch)
    nb = batch // tb

    # VMEM budget: pipeline buffers + resident weights + full-batch h cache, with 2x margin,
    # clamped to stay within the v7x 64 MiB physical VMEM.
    need = (2 * tb * d_in_p * x.dtype.itemsize        # x tiles (double-buffered)
            + 2 * tb * d_out_p * 4                    # out tiles
            + 2 * (d_in_p * hid_p + hid_p * d_out_p)  # bf16 weights (resident)
            + batch * hid_p * 4                       # cached h
            + 8 * hid_p * 4 + 4 * d_out_p * 4)        # small vectors / scratch
    vmem_limit = int(min(max(2 * need, 32 << 20), 56 << 20))

    kernel = functools.partial(_fused_kernel, tb=tb, inv_batch=1.0 / batch)

    out_p = pl.pallas_call(
        kernel,
        grid=(2, nb),                                  # (phase, batch tile)
        in_specs=[
            # x: walked tile-by-tile in phase 0; parked on its last block in phase 1
            # (same block index -> no redundant HBM reads).
            pl.BlockSpec((tb, d_in_p), lambda p, i: (i * (1 - p) + (nb - 1) * p, 0)),
            pl.BlockSpec((d_in_p, hid_p), lambda p, i: (0, 0)),    # w1 resident
            pl.BlockSpec((1, hid_p), lambda p, i: (0, 0)),         # gamma
            pl.BlockSpec((1, hid_p), lambda p, i: (0, 0)),         # beta
            pl.BlockSpec((hid_p, d_out_p), lambda p, i: (0, 0)),   # w2 resident
            pl.BlockSpec((1, d_out_p), lambda p, i: (0, 0)),       # b2
        ],
        # Output parks on block 0 during phase 0 (never written, so never flushed with garbage),
        # then walks the batch tiles in phase 1.
        out_specs=pl.BlockSpec((tb, d_out_p), lambda p, i: (i * p, 0)),
        out_shape=jax.ShapeDtypeStruct((batch, d_out_p), x.dtype),
        scratch_shapes=[
            pltpu.VMEM((batch, hid_p), jnp.float32),   # cached h = x @ w1 (pre-BN)
            pltpu.VMEM((1, hid_p), jnp.float32),       # per-feature sum
            pltpu.VMEM((1, hid_p), jnp.float32),       # per-feature sum of squares
            pltpu.VMEM((1, hid_p), jnp.float32),       # folded BN scale s
            pltpu.VMEM((1, hid_p), jnp.float32),       # folded BN shift t
        ],
        compiler_params=pltpu.CompilerParams(
            dimension_semantics=("arbitrary", "arbitrary"),  # phase + resident accumulators
            vmem_limit_bytes=vmem_limit),
    )(x, w1_p, gamma_p, beta_p, w2_p, b2_p)

    return out_p if d_out == d_out_p else out_p[:, :d_out]


def init_params(key, d_in, hid, d_out, dtype=jnp.float32):
    """Deterministic synthetic parameters (PyTorch-style uniform fan-in init)."""
    k1, k2, k3 = jax.random.split(key, 3)
    bound1 = 1.0 / jnp.sqrt(d_in)
    bound2 = 1.0 / jnp.sqrt(hid)
    # nn.Linear stores weight as [out, in]; we keep [in, out] for the kernel.
    w1 = jax.random.uniform(k1, (d_in, hid), dtype, -bound1, bound1)
    w2 = jax.random.uniform(k2, (hid, d_out), dtype, -bound2, bound2)
    b2 = jax.random.uniform(k3, (d_out,), dtype, -bound2, bound2)
    gamma = jnp.ones((hid,), dtype)    # BatchNorm1d affine weight init
    beta = jnp.zeros((hid,), dtype)    # BatchNorm1d affine bias init
    return w1, gamma, beta, w2, b2


def reference_forward(x, w1, gamma, beta, w2, b2):
    """Plain-JAX reference mirroring the PyTorch forward (same bf16 matmul inputs)."""
    h = jnp.dot(x.astype(jnp.bfloat16), w1.astype(jnp.bfloat16),
                preferred_element_type=jnp.float32)
    mean = jnp.mean(h, axis=0, keepdims=True)
    var = jnp.mean(jnp.square(h - mean), axis=0, keepdims=True)     # biased variance
    h = (h - mean) * jax.lax.rsqrt(var + BN_EPS) * gamma + beta
    h = jnp.maximum(h, 0.0)
    out = jnp.dot(h.astype(jnp.bfloat16), w2.astype(jnp.bfloat16),
                  preferred_element_type=jnp.float32) + b2
    return out.astype(x.dtype)


if __name__ == "__main__":
    # Docstring config of ProjectionHead: (256, 256, BatchNorm1d(256), ReLU), (256, 128, None, None)
    B, D_IN, HID, D_OUT = 256, 256, 256, 128

    key = jax.random.PRNGKey(0)
    kx, kp = jax.random.split(key)
    x = jax.random.normal(kx, (B, D_IN), jnp.float32)
    w1, gamma, beta, w2, b2 = init_params(kp, D_IN, HID, D_OUT)

    prepared = prepare_params(w1, gamma, beta, w2, b2)   # pad + cast once, outside the jit

    # Default path (largest dividing tile -> single batch tile here).
    out = projection_head_forward(x, *prepared, d_out=D_OUT)
    out = jax.block_until_ready(out)

    # Explicitly tiled path (2 batch tiles) exercising the two-phase pipelined structure.
    out_tiled = projection_head_forward(x, *prepared, d_out=D_OUT, batch_tile=128)
    out_tiled = jax.block_until_ready(out_tiled)

    ref = reference_forward(x, w1, gamma, beta, w2, b2)
    assert out.shape == (B, D_OUT)
    assert jnp.allclose(out, ref, atol=3e-2, rtol=3e-2), (
        "mismatch vs reference: max abs diff = "
        f"{float(jnp.max(jnp.abs(out - ref)))}")
    assert jnp.allclose(out_tiled, ref, atol=3e-2, rtol=3e-2), (
        "tiled mismatch vs reference: max abs diff = "
        f"{float(jnp.max(jnp.abs(out_tiled - ref)))}")

    print("KERNEL_OK")
</pallas_src>

<mosaic_0001>
module attributes {stable_mosaic.version = 11 : i64} {
  func.func @_fused_kernel(%arg0: i32, %arg1: i32, %arg2: memref<256x256xf32, #tpu.memory_space<vmem>>, %arg3: memref<256x256xbf16, #tpu.memory_space<vmem>>, %arg4: memref<1x256xf32, #tpu.memory_space<vmem>>, %arg5: memref<1x256xf32, #tpu.memory_space<vmem>>, %arg6: memref<256x128xbf16, #tpu.memory_space<vmem>>, %arg7: memref<1x128xf32, #tpu.memory_space<vmem>>, %arg8: memref<256x128xf32, #tpu.memory_space<vmem>>, %arg9: memref<256x256xf32, #tpu.memory_space<vmem>>, %arg10: memref<1x256xf32, #tpu.memory_space<vmem>>, %arg11: memref<1x256xf32, #tpu.memory_space<vmem>>, %arg12: memref<1x256xf32, #tpu.memory_space<vmem>>, %arg13: memref<1x256xf32, #tpu.memory_space<vmem>>) attributes {dimension_semantics = [#tpu.dimension_semantics<arbitrary>, #tpu.dimension_semantics<arbitrary>], iteration_bounds = array<i64: 2, 1>, scalar_prefetch = 0 : i64, scratch_operands = 5 : i64, tpu.core_type = #tpu.core_type<tc>, window_params = [{transform_indices = @transform_0, window_bounds = array<i64: 256, 256>}, {pipeline_mode = #tpu.pipeline_mode<synchronous>, transform_indices = @transform_1, window_bounds = array<i64: 256, 256>}, {pipeline_mode = #tpu.pipeline_mode<synchronous>, transform_indices = @transform_2, window_bounds = array<i64: 1, 256>}, {pipeline_mode = #tpu.pipeline_mode<synchronous>, transform_indices = @transform_3, window_bounds = array<i64: 1, 256>}, {pipeline_mode = #tpu.pipeline_mode<synchronous>, transform_indices = @transform_4, window_bounds = array<i64: 256, 128>}, {pipeline_mode = #tpu.pipeline_mode<synchronous>, transform_indices = @transform_5, window_bounds = array<i64: 1, 128>}, {transform_indices = @transform_6, window_bounds = array<i64: 256, 128>}]} {
    %c0_i32 = arith.constant 0 : i32
    %0 = arith.cmpi eq, %arg0, %c0_i32 : i32
    %c0_i32_0 = arith.constant 0 : i32
    %1 = arith.cmpi eq, %arg1, %c0_i32_0 : i32
    %2 = arith.andi %0, %1 : i1
    %3 = arith.extui %2 : i1 to i32
    %c0_i32_1 = arith.constant 0 : i32
    %4 = arith.cmpi ne, %3, %c0_i32_1 : i32
    scf.if %4 {
      %cst = arith.constant 0.000000e+00 : f32
      %16 = vector.broadcast %cst : f32 to vector<1x256xf32>
      %c0 = arith.constant 0 : index
      %c0_8 = arith.constant 0 : index
      %17 = vector.load %arg10[%c0, %c0_8] : memref<1x256xf32, #tpu.memory_space<vmem>>, vector<1x256xf32>
      tpu.vector_store %arg10[%c0, %c0_8], %16 {strides = array<i32>} : memref<1x256xf32, #tpu.memory_space<vmem>>, vector<1x256xf32>,
      %cst_9 = arith.constant 0.000000e+00 : f32
      %18 = vector.broadcast %cst_9 : f32 to vector<1x256xf32>
      %c0_10 = arith.constant 0 : index
      %c0_11 = arith.constant 0 : index
      %19 = vector.load %arg11[%c0_10, %c0_11] : memref<1x256xf32, #tpu.memory_space<vmem>>, vector<1x256xf32>
      tpu.vector_store %arg11[%c0_10, %c0_11], %18 {strides = array<i32>} : memref<1x256xf32, #tpu.memory_space<vmem>>, vector<1x256xf32>,
    } else {
    }
    %c0_i32_2 = arith.constant 0 : i32
    %5 = arith.cmpi eq, %arg0, %c0_i32_2 : i32
    %6 = arith.extui %5 : i1 to i32
    %c0_i32_3 = arith.constant 0 : i32
    %7 = arith.cmpi ne, %6, %c0_i32_3 : i32
    scf.if %7 {
      %c0 = arith.constant 0 : index
      %c0_8 = arith.constant 0 : index
      %16 = vector.load %arg2[%c0, %c0_8] : memref<256x256xf32, #tpu.memory_space<vmem>>, vector<256x256xf32>
      %17 = arith.truncf %16 : vector<256x256xf32> to vector<256x256xbf16>
      %c0_9 = arith.constant 0 : index
      %c0_10 = arith.constant 0 : index
      %18 = vector.load %arg3[%c0_9, %c0_10] : memref<256x256xbf16, #tpu.memory_space<vmem>>, vector<256x256xbf16>
      %cst = arith.constant dense<0.000000e+00> : vector<256x256xf32>
      %19 = tpu.matmul %17, %18, %cst {dimension_numbers = #tpu.dot_dimension_numbers<[1], [0], [0], [1], [0, 0, 1, 1], [], []>} : vector<256x256xbf16>, vector<256x256xbf16>, vector<256x256xf32> -> vector<256x256xf32>
      %c256_i32 = arith.constant 256 : i32
      %20 = arith.muli %arg1, %c256_i32 : i32
      %21 = tpu.assume_multiple %20, 256 : i32
      %22 = arith.index_cast %21 : i32 to index
      %c0_11 = arith.constant 0 : index
      %23 = vector.load %arg9[%22, %c0_11] : memref<256x256xf32, #tpu.memory_space<vmem>>, vector<256x256xf32>
      tpu.vector_store %arg9[%22, %c0_11], %19 {strides = array<i32>} : memref<256x256xf32, #tpu.memory_space<vmem>>, vector<256x256xf32>,
      %c0_12 = arith.constant 0 : index
      %c0_13 = arith.constant 0 : index
      %24 = vector.load %arg10[%c0_12, %c0_13] : memref<1x256xf32, #tpu.memory_space<vmem>>, vector<1x256xf32>
      %cst_14 = arith.constant dense<0.000000e+00> : vector<256xf32>
      %25 = vector.multi_reduction <add>, %19, %cst_14 [0] : vector<256x256xf32> to vector<256xf32>
      %26 = vector.shape_cast %25 : vector<256xf32> to vector<1x256xf32>
      %27 = arith.addf %24, %26 : vector<1x256xf32>
      %c0_15 = arith.constant 0 : index
      %c0_16 = arith.constant 0 : index
      %28 = vector.load %arg10[%c0_15, %c0_16] : memref<1x256xf32, #tpu.memory_space<vmem>>, vector<1x256xf32>
      tpu.vector_store %arg10[%c0_15, %c0_16], %27 {strides = array<i32>} : memref<1x256xf32, #tpu.memory_space<vmem>>, vector<1x256xf32>,
      %c0_17 = arith.constant 0 : index
      %c0_18 = arith.constant 0 : index
      %29 = vector.load %arg11[%c0_17, %c0_18] : memref<1x256xf32, #tpu.memory_space<vmem>>, vector<1x256xf32>
      %30 = arith.mulf %19, %19 : vector<256x256xf32>
      %cst_19 = arith.constant dense<0.000000e+00> : vector<256xf32>
      %31 = vector.multi_reduction <add>, %30, %cst_19 [0] : vector<256x256xf32> to vector<256xf32>
      %32 = vector.shape_cast %31 : vector<256xf32> to vector<1x256xf32>
      %33 = arith.addf %29, %32 : vector<1x256xf32>
      %c0_20 = arith.constant 0 : index
      %c0_21 = arith.constant 0 : index
      %34 = vector.load %arg11[%c0_20, %c0_21] : memref<1x256xf32, #tpu.memory_space<vmem>>, vector<1x256xf32>
      tpu.vector_store %arg11[%c0_20, %c0_21], %33 {strides = array<i32>} : memref<1x256xf32, #tpu.memory_space<vmem>>, vector<1x256xf32>,
    } else {
    }
    %c1_i32 = arith.constant 1 : i32
    %8 = arith.cmpi eq, %arg0, %c1_i32 : i32
    %c0_i32_4 = arith.constant 0 : i32
    %9 = arith.cmpi eq, %arg1, %c0_i32_4 : i32
    %10 = arith.andi %8, %9 : i1
    %11 = arith.extui %10 : i1 to i32
    %c0_i32_5 = arith.constant 0 : i32
    %12 = arith.cmpi ne, %11, %c0_i32_5 : i32
    scf.if %12 {
      %c0 = arith.constant 0 : index
      %c0_8 = arith.constant 0 : index
      %16 = vector.load %arg10[%c0, %c0_8] : memref<1x256xf32, #tpu.memory_space<vmem>>, vector<1x256xf32>
      %cst = arith.constant 3.906250e-03 : f32
      %17 = vector.broadcast %cst : f32 to vector<1x256xf32>
      %18 = arith.mulf %16, %17 : vector<1x256xf32>
      %c0_9 = arith.constant 0 : index
      %c0_10 = arith.constant 0 : index
      %19 = vector.load %arg11[%c0_9, %c0_10] : memref<1x256xf32, #tpu.memory_space<vmem>>, vector<1x256xf32>
      %cst_11 = arith.constant 3.906250e-03 : f32
      %20 = vector.broadcast %cst_11 : f32 to vector<1x256xf32>
      %21 = arith.mulf %19, %20 : vector<1x256xf32>
      %22 = arith.mulf %18, %18 : vector<1x256xf32>
      %23 = arith.subf %21, %22 : vector<1x256xf32>
      %cst_12 = arith.constant 0.000000e+00 : f32
      %24 = vector.broadcast %cst_12 : f32 to vector<1x256xf32>
      %25 = arith.maximumf %23, %24 : vector<1x256xf32>
      %c0_13 = arith.constant 0 : index
      %c0_14 = arith.constant 0 : index
      %26 = vector.load %arg4[%c0_13, %c0_14] : memref<1x256xf32, #tpu.memory_space<vmem>>, vector<1x256xf32>
      %cst_15 = arith.constant 9.99999974E-6 : f32
      %27 = vector.broadcast %cst_15 : f32 to vector<1x256xf32>
      %28 = arith.addf %25, %27 : vector<1x256xf32>
      %29 = math.rsqrt %28 : vector<1x256xf32>
      %30 = arith.mulf %26, %29 : vector<1x256xf32>
      %c0_16 = arith.constant 0 : index
      %c0_17 = arith.constant 0 : index
      %31 = vector.load %arg12[%c0_16, %c0_17] : memref<1x256xf32, #tpu.memory_space<vmem>>, vector<1x256xf32>
      tpu.vector_store %arg12[%c0_16, %c0_17], %30 {strides = array<i32>} : memref<1x256xf32, #tpu.memory_space<vmem>>, vector<1x256xf32>,
      %c0_18 = arith.constant 0 : index
      %c0_19 = arith.constant 0 : index
      %32 = vector.load %arg5[%c0_18, %c0_19] : memref<1x256xf32, #tpu.memory_space<vmem>>, vector<1x256xf32>
      %33 = arith.mulf %18, %30 : vector<1x256xf32>
      %34 = arith.subf %32, %33 : vector<1x256xf32>
      %c0_20 = arith.constant 0 : index
      %c0_21 = arith.constant 0 : index
      %35 = vector.load %arg13[%c0_20, %c0_21] : memref<1x256xf32, #tpu.memory_space<vmem>>, vector<1x256xf32>
      tpu.vector_store %arg13[%c0_20, %c0_21], %34 {strides = array<i32>} : memref<1x256xf32, #tpu.memory_space<vmem>>, vector<1x256xf32>,
    } else {
    }
    %c1_i32_6 = arith.constant 1 : i32
    %13 = arith.cmpi eq, %arg0, %c1_i32_6 : i32
    %14 = arith.extui %13 : i1 to i32
    %c0_i32_7 = arith.constant 0 : i32
    %15 = arith.cmpi ne, %14, %c0_i32_7 : i32
    scf.if %15 {
      %c256_i32 = arith.constant 256 : i32
      %16 = arith.muli %arg1, %c256_i32 : i32
      %17 = tpu.assume_multiple %16, 256 : i32
      %18 = arith.index_cast %17 : i32 to index
      %c0 = arith.constant 0 : index
      %19 = vector.load %arg9[%18, %c0] : memref<256x256xf32, #tpu.memory_space<vmem>>, vector<256x256xf32>
      %c0_8 = arith.constant 0 : index
      %c0_9 = arith.constant 0 : index
      %20 = vector.load %arg12[%c0_8, %c0_9] : memref<1x256xf32, #tpu.memory_space<vmem>>, vector<1x256xf32>
      %21 = vector.broadcast %20 : vector<1x256xf32> to vector<256x256xf32>
      %22 = arith.mulf %19, %21 : vector<256x256xf32>
      %c0_10 = arith.constant 0 : index
      %c0_11 = arith.constant 0 : index
      %23 = vector.load %arg13[%c0_10, %c0_11] : memref<1x256xf32, #tpu.memory_space<vmem>>, vector<1x256xf32>
      %24 = vector.broadcast %23 : vector<1x256xf32> to vector<256x256xf32>
      %25 = arith.addf %22, %24 : vector<256x256xf32>
      %cst = arith.constant 0.000000e+00 : f32
      %26 = vector.broadcast %cst : f32 to vector<256x256xf32>
      %27 = arith.maximumf %25, %26 : vector<256x256xf32>
      %28 = arith.truncf %27 : vector<256x256xf32> to vector<256x256xbf16>
      %c0_12 = arith.constant 0 : index
      %c0_13 = arith.constant 0 : index
      %29 = vector.load %arg6[%c0_12, %c0_13] : memref<256x128xbf16, #tpu.memory_space<vmem>>, vector<256x128xbf16>
      %cst_14 = arith.constant dense<0.000000e+00> : vector<256x128xf32>
      %30 = tpu.matmul %28, %29, %cst_14 {dimension_numbers = #tpu.dot_dimension_numbers<[1], [0], [0], [1], [0, 0, 1, 1], [], []>} : vector<256x256xbf16>, vector<256x128xbf16>, vector<256x128xf32> -> vector<256x128xf32>
      %c0_15 = arith.constant 0 : index
      %c0_16 = arith.constant 0 : index
      %31 = vector.load %arg7[%c0_15, %c0_16] : memref<1x128xf32, #tpu.memory_space<vmem>>, vector<1x128xf32>
      %32 = vector.broadcast %31 : vector<1x128xf32> to vector<256x128xf32>
      %33 = arith.addf %30, %32 : vector<256x128xf32>
      %c0_17 = arith.constant 0 : index
      %c0_18 = arith.constant 0 : index
      %34 = vector.load %arg8[%c0_17, %c0_18] : memref<256x128xf32, #tpu.memory_space<vmem>>, vector<256x128xf32>
      tpu.vector_store %arg8[%c0_17, %c0_18], %33 {strides = array<i32>} : memref<256x128xf32, #tpu.memory_space<vmem>>, vector<256x128xf32>,
    } else {
    }
    return
  }
  func.func @transform_0(%arg0: i32, %arg1: i32) -> (i32, i32) {
    %c1_i32 = arith.constant 1 : i32
    %0 = arith.subi %c1_i32, %arg0 : i32
    %1 = arith.muli %arg1, %0 : i32
    %c0_i32 = arith.constant 0 : i32
    %2 = arith.muli %c0_i32, %arg0 : i32
    %3 = arith.addi %1, %2 : i32
    %c0_i32_0 = arith.constant 0 : i32
    %c0_i32_1 = arith.constant 0 : i32
    return %3, %c0_i32_0 : i32, i32
  }
  func.func @transform_1(%arg0: i32, %arg1: i32) -> (i32, i32) {
    %c0_i32 = arith.constant 0 : i32
    %c0_i32_0 = arith.constant 0 : i32
    %c0_i32_1 = arith.constant 0 : i32
    return %c0_i32, %c0_i32_0 : i32, i32
  }
  func.func @transform_2(%arg0: i32, %arg1: i32) -> (i32, i32) {
    %c0_i32 = arith.constant 0 : i32
    %c0_i32_0 = arith.constant 0 : i32
    %c0_i32_1 = arith.constant 0 : i32
    return %c0_i32, %c0_i32_0 : i32, i32
  }
  func.func @transform_3(%arg0: i32, %arg1: i32) -> (i32, i32) {
    %c0_i32 = arith.constant 0 : i32
    %c0_i32_0 = arith.constant 0 : i32
    %c0_i32_1 = arith.constant 0 : i32
    return %c0_i32, %c0_i32_0 : i32, i32
  }
  func.func @transform_4(%arg0: i32, %arg1: i32) -> (i32, i32) {
    %c0_i32 = arith.constant 0 : i32
    %c0_i32_0 = arith.constant 0 : i32
    %c0_i32_1 = arith.constant 0 : i32
    return %c0_i32, %c0_i32_0 : i32, i32
  }
  func.func @transform_5(%arg0: i32, %arg1: i32) -> (i32, i32) {
    %c0_i32 = arith.constant 0 : i32
    %c0_i32_0 = arith.constant 0 : i32
    %c0_i32_1 = arith.constant 0 : i32
    return %c0_i32, %c0_i32_0 : i32, i32
  }
  func.func @transform_6(%arg0: i32, %arg1: i32) -> (i32, i32) {
    %0 = arith.muli %arg1, %arg0 : i32
    %c0_i32 = arith.constant 0 : i32
    %c0_i32_0 = arith.constant 0 : i32
    return %0, %c0_i32 : i32, i32
  }
}

</mosaic_0001>

<bundles_post_ra>
// kernel: projection_head_forward.1
= control target key start
LH: loop header
LB: loop body
LE: loop exit
PB: predicated region body
PF: predicated region fallthrough
CT: control target
= control target key end

     0   :  { %11 = vsyncpa [#allocation8], 0  ;;  %s3040_s0 = inlined_call_operand.hbm [shape: f32[256,256], index: 0, kind: input, shape index: {}]   ;;  %s3041_s1 = inlined_call_operand.hbm [shape: bf16[256,256], index: 1, kind: input, shape index: {}]   ;;  %s3042_s2 = inlined_call_operand.vmem [shape: f32[1,256], index: 2, kind: input, shape index: {}]   ;;  %s3043_s3 = inlined_call_operand.vmem [shape: f32[1,256], index: 3, kind: input, shape index: {}]   ;;  %s3044_s4 = inlined_call_operand.hbm [shape: bf16[256,128], index: 4, kind: input, shape index: {}]   ;;  %s3045_s5 = inlined_call_operand.vmem [shape: f32[1,128], index: 5, kind: input, shape index: {}]   ;;  %s3046_s6 = inlined_call_operand.hbm [shape: f32[256,128], index: 6, kind: output, shape index: {}]  }
   0x1   :  { %13 = vsyncpa [#allocation8 + $0x1], 0 }
   0x2   :  { %14 = vsyncpa [#allocation11], 0 }
   0x3   :  { %15 = vsyncpa [#allocation9], 0 }
   0x4   :  { %17 = vsyncpa [#allocation9 + $0x1], 0  ;;  %s2513_s21 = smov 0   ;;  %s2515_s22 = smov 0  }
   0x5   :  { %s2517_s23 = smov 0  }
   0x6 LB: > { %s1943_s24 = sadd.s32 4294967295, %s2462_s23   ;;  %s1944_s25 = sadd.s32 4294967294, %s2462_s23   ;;  %s2462_s23 = sphi %s2517_s23, %s23_s23   ;;  %s2458_s22 = sphi %s2515_s22, %s3059_s22   ;;  %s2454_s21 = sphi %s2513_s21, %s3058_s21  }
   0x7   : > { %s35_s26 = sadd.s32 1, %s2458_s22  ;;  %p1945_p0 = scmp.ge.s32.totalorder %s2462_s23, 1 }
   0x8   : > { %p37_p1 = scmp.ge.s32.totalorder %s35_s26, 2  ;;  %p203_p2 = scmp.lt.s32.totalorder %s2462_s23, 3 }
   0x9   : > { %p2535_p3 = scmp.eq.s32.totalorder %s1943_s24, 0  ;;  %s2464_s29 = smov [#allocation10]  }
   0xa   : > { %s3061_s26 = smov (%p37_p1, %s35_s26), 0  ;;  %p2541_p4 = pnand %p1945_p0, %p203_p2 }
   0xb   : > { %s3050_s27 = scalar_select %p2535_p3, 1, 0 }
   0xc   : > { %s3051_s28 = scalar_select %p2541_p4, 1, 0 }
   0xd   : > { %s215_s30 = sshll.u32 %s2464_s29, 4  ;;  %p2189_p5 = pneg %p2541_p4  ;;  %s216_s30 = int_to_ptr.vmem [resolvable:$true] %s215_s30 }
   0xe   : > { %s2465_s8 = smov [#allocation12]   ;;  %s2318_s12 = scalar_lea.hbm %s3041_s1, 4096 }
   0xf   : > { %p2550_p7 = pnand %p2535_p3, %p2189_p5  ;;  %s234_s9 = sshll.u32 %s2465_s8, 4  ;;  %s235_s9 = int_to_ptr.vmem [resolvable:$true] %s234_s9 }
  0x10   : > { %p2319_p8 = scmp.ne.s32.totalorder %s3041_s1, %s2318_s12  ;;  %p2325_p12 = scmp.lt.u32.totalorder %s2318_s12, %s3041_s1 }
  0x11   : > { %p2320_p9 = pneg %p2550_p7 }
  0x13   : > { %p2321_p10 = pnand %p2320_p9, %p2319_p8 }
  0x15   : > { %p2322_p11 = pneg %p2321_p10 }
  0x17   : > { %p2327_p13 = pnand %p2325_p12, %p2322_p11 }
  0x19   : > { %2330 = shalt.err (!%p2327_p13)
}
  0x1a   : > { %s2331_s17 = scalar_lea.vmem %s216_s30, 4096  ;;  %p2339_p5 = scmp.lt.s32.totalorder %s216_s30, %s216_s30 }
  0x1b   : > { %p2332_p0 = scmp.ne.s32.totalorder %s216_s30, %s2331_s17  ;;  %p2340_p6 = scmp.lt.s32.totalorder %s2331_s17, %s2331_s17 }
  0x1d   : > { %p2334_p1 = pnand %p2332_p0, %p2320_p9  ;;  %p2341_p3 = por %p2340_p6, %p2339_p5 }
  0x1f   : > { %p2335_p2 = pneg %p2334_p1 }
  0x21   : > { %p2342_p4 = pnand %p2341_p3, %p2335_p2 }
  0x23   : > { %2345 = shalt.err (!%p2342_p4)
}
  0x24   : > { %s2466_s18 = smov 128   ;;  %s2467_s19 = smov 8  }
  0x25   : > { %2192 = dma.hbm_to_vmem [thread:$0]  (!%p2550_p7), %s3041_s1, 4096, %s216_s30, [#allocation11], %s2466_s18, %s2466_s18, %s2467_s19  }
  0x26   : > { %s2346_s11 = scalar_lea.hbm %s3044_s4, 2048 }
  0x27   : > { %p2347_p6 = scmp.ne.s32.totalorder %s3044_s4, %s2346_s11  ;;  %p2353_p8 = scmp.lt.u32.totalorder %s2346_s11, %s3044_s4 }
  0x29   : > { %p2349_p3 = pnand %p2347_p6, %p2320_p9 }
  0x2b   : > { %p2350_p4 = pneg %p2349_p3 }
  0x2d   : > { %p2355_p10 = pnand %p2353_p8, %p2350_p4 }
  0x2f   : > { %2358 = shalt.err (!%p2355_p10)
}
  0x30   : > { %s2359_s30 = scalar_lea.vmem %s235_s9, 2048  ;;  %p2367_p0 = scmp.lt.s32.totalorder %s235_s9, %s235_s9 }
  0x31   : > { %p2360_p11 = scmp.ne.s32.totalorder %s235_s9, %s2359_s30  ;;  %p2368_p1 = scmp.lt.s32.totalorder %s2359_s30, %s2359_s30 }
  0x33   : > { %p2362_p12 = pnand %p2360_p11, %p2320_p9  ;;  %p2369_p2 = por %p2368_p1, %p2367_p0 }
  0x35   : > { %p2363_p13 = pneg %p2362_p12 }
  0x37   : > { %p2370_p5 = pnand %p2369_p2, %p2363_p13 }
  0x39   : > { %2373 = shalt.err (!%p2370_p5)
}
  0x3a   : > { %s2468_s16 = smov 64   ;;  %s2469_s17 = smov 4  }
  0x3b   : > { %2195 = dma.hbm_to_vmem [thread:$0]  (!%p2550_p7), %s3044_s4, 2048, %s235_s9, [#allocation11], %s2468_s16, %s2468_s16, %s2469_s17  }
  0x3c   : > { %p2206_p6 = scmp.lt.s32.totalorder %s2462_s23, 2  ;;  %p2207_p3 = scmp.eq.s32.totalorder %s2462_s23, 0 }
  0x3d   : > { %s2470_s20 = smov [#allocation7]   ;;  %s2374_s12 = scalar_lea.hbm %s3040_s0, 8192 }
  0x3e   : > { %s265_s29 = sshll.u32 %s2470_s20, 4  ;;  %p2598_p9 = pnand %p2207_p3, %p2206_p6  ;;  %s266_s29 = int_to_ptr.vmem [resolvable:$true] %s265_s29 }
  0x3f   : > { %p2375_p4 = scmp.ne.s32.totalorder %s3040_s0, %s2374_s12  ;;  %p2381_p11 = scmp.lt.u32.totalorder %s2374_s12, %s3040_s0 }
  0x40   : > { %p2376_p7 = pneg %p2598_p9 }
  0x42   : > { %p2377_p8 = pnand %p2376_p7, %p2375_p4 }
  0x44   : > { %p2378_p10 = pneg %p2377_p8 }
  0x46   : > { %p2383_p12 = pnand %p2381_p11, %p2378_p10 }
  0x48   : > { %2386 = shalt.err (!%p2383_p12)
}
  0x49   : > { %s2387_s15 = scalar_lea.vmem %s266_s29, 8192  ;;  %s2394_s30 = scalar_lea.vmem %s266_s29, 16384 }
  0x4a   : > { %p2388_p13 = scmp.ne.s32.totalorder %s266_s29, %s2387_s15  ;;  %p2395_p2 = scmp.lt.s32.totalorder %s266_s29, %s266_s29 }
  0x4b   : > { %p2396_p5 = scmp.lt.s32.totalorder %s2394_s30, %s2387_s15 }
  0x4c   : > { %p2390_p0 = pnand %p2388_p13, %p2376_p7 }
  0x4d   : > { %p2397_p6 = por %p2396_p5, %p2395_p2 }
  0x4e   : > { %p2391_p1 = pneg %p2390_p0 }
  0x50   : > { %p2398_p3 = pnand %p2397_p6, %p2391_p1 }
  0x52   : > { %2401 = shalt.err (!%p2398_p3)
}
  0x53   : > { %s2471_s16 = smov 256   ;;  %s2472_s17 = smov 16  }
  0x54   : > { %2199 = dma.hbm_to_vmem [thread:$0]  (!%p2598_p9), %s3040_s0, 8192, %s266_s29, [#allocation8], %s2471_s16, %s2471_s16, %s2472_s17  }
  0x55   : > { %p3054_p4 = scmp.ne.s32.totalorder %s3051_s28, 0 }
  0x56   : > { %p3055_p7 = scmp.ne.s32.totalorder (!%p3054_p4), %s3050_s27, 0 }
  0x57   : > { %277 = sbr.rel (%p3054_p4) target bundleno = 867 (0x363), region = 44 }
  0x5e   : > { %2441 = dma.done.wait (%p3055_p7), [#allocation8], 8192  }
  0x5f   : > { %2443 = vsyncadd (%p3055_p7), [#allocation8], 4294959104 }
  0x60   : > { %2445 = dma.done.wait (%p3055_p7), [#allocation11], 6144  }
  0x61   : > { %2447 = vsyncadd (%p3055_p7), [#allocation11], 4294961152  ;;  %p326_p8 = scmp.eq.s32.totalorder %s2454_s21, 0 }
  0x62   : > { %v332_v0 = vlaneseq (%p326_p8)  ;;  %v2473_v1 = vmov (%p326_p8), 0.0  }
  0x63   : > { %331 = sbr.rel (!%p326_p8) target bundleno = 106 (0x6a), region = 60 }
  0x64   : > { %vm334_vm0 = vcmp.lt.s32.totalorder (%p326_p8), %v332_v0, 256 }
  0x65   : > { %336 = vst.msk [vmem:[#allocation3] sm:$0x3] (%p326_p8), %vm334_vm0, %v2473_v1  ;;  %337 = vst.msk [vmem:[#allocation4] sm:$0x3] (%p326_p8), %vm334_vm0, %v2473_v1 }
  0x6a PF: > { %p1955_p9 = scmp.ne.s32.totalorder %s2454_s21, 0 }
  0x6b   : > { %v2252_v2 = vld [vmem:[#allocation10 + $0x4] ss:$8 sps:$4 sm:$0xff] (!%p1955_p9)   ;;  %v2254_v3 = vld [vmem:[#allocation10] ss:$8 sps:$4 sm:$0xff] (!%p1955_p9)   ;;  %v2255_v4 = vld [vmem:[#allocation10 + $0x14] ss:$8 sps:$4 sm:$0xff] (!%p1955_p9)  }
  0x6c   : > { %340 = sbr.rel (%p1955_p9) target bundleno = 500 (0x1f4), region = 64  ;;  %629 = vmatprep.subr.bf16.mxu0 (!%p1955_p9), %v2252_v2  ;;  %2125 = vmatprep.subr.bf16.mxu1 (!%p1955_p9), %v2252_v2  ;;  %v2257_v5 = vld [vmem:[#allocation10 + $0x10] ss:$8 sps:$4 sm:$0xff] (!%p1955_p9)   ;;  %v2258_v6 = vld [vmem:[#allocation10 + $0x24] ss:$8 sps:$4 sm:$0xff] (!%p1955_p9)  }
  0x6d   : > { %630 = vmatpush1.bf16.msra.mxu0 (!%p1955_p9), %v2254_v3  ;;  %2141 = vmatpush1.bf16.msra.mxu1 (!%p1955_p9), %v2254_v3  ;;  %v2260_v7 = vld [vmem:[#allocation10 + $0x20] ss:$8 sps:$4 sm:$0xff] (!%p1955_p9)   ;;  %v2261_v8 = vld [vmem:[#allocation10 + $0x34] ss:$8 sps:$4 sm:$0xff] (!%p1955_p9)   ;;  %v2263_v9 = vld [vmem:[#allocation10 + $0x30] ss:$8 sps:$4 sm:$0xff] (!%p1955_p9)  }
  0x6e   : > { %631 = vmatprep.subr.bf16.mxu0 (!%p1955_p9), %v2255_v4  ;;  %2126 = vmatprep.subr.bf16.mxu1 (!%p1955_p9), %v2255_v4  ;;  %v2264_v10 = vld [vmem:[#allocation10 + $0x44] ss:$8 sps:$4 sm:$0xff] (!%p1955_p9)   ;;  %v2266_v11 = vld [vmem:[#allocation10 + $0x40] ss:$8 sps:$4 sm:$0xff] (!%p1955_p9)   ;;  %v2267_v12 = vld [vmem:[#allocation10 + $0x54] ss:$8 sps:$4 sm:$0xff] (!%p1955_p9)  }
  0x6f   : > { %v2269_v13 = vld [vmem:[#allocation10 + $0x50] ss:$8 sps:$4 sm:$0xff] (!%p1955_p9)   ;;  %v2270_v14 = vld [vmem:[#allocation10 + $0x64] ss:$8 sps:$4 sm:$0xff] (!%p1955_p9)   ;;  %v2272_v18 = vld [vmem:[#allocation10 + $0x60] ss:$8 sps:$4 sm:$0xff] (!%p1955_p9)  }
  0x70   : > { %v342_v15 = vld [vmem:[#allocation7 + $0x8] sm:$0xff] (!%p1955_p9)  ;;  %v344_v16 = vld [vmem:[#allocation7 + $0x18] sm:$0xff] (!%p1955_p9)  ;;  %v341_v40 = vld [vmem:[#allocation7] sm:$0xff] (!%p1955_p9) }
  0x71   : > { %632 = vmatpush1.bf16.msra.mxu0 (!%p1955_p9), %v2257_v5  ;;  %2142 = vmatpush1.bf16.msra.mxu1 (!%p1955_p9), %v2257_v5  ;;  %v406_v17 = vpack.c.bf16 (!%p1955_p9), %v344_v16, %v342_v15  ;;  %v2273_v19 = vld [vmem:[#allocation10 + $0x74] ss:$8 sps:$4 sm:$0xff] (!%p1955_p9)   ;;  %v374_v20 = vld [vmem:[#allocation7 + $0x108] sm:$0xff] (!%p1955_p9)  ;;  %v2275_v21 = vld [vmem:[#allocation10 + $0x70] ss:$8 sps:$4 sm:$0xff] (!%p1955_p9)  }
  0x72   : > { %633 = vmatprep.subr.bf16.mxu0 (!%p1955_p9), %v2258_v6  ;;  %2127 = vmatprep.subr.bf16.mxu1 (!%p1955_p9), %v2258_v6  ;;  %v376_v22 = vld [vmem:[#allocation7 + $0x118] sm:$0xff] (!%p1955_p9)  ;;  %v2276_v23 = vld [vmem:[#allocation10 + $0x84] ss:$8 sps:$4 sm:$0xff] (!%p1955_p9)   ;;  %v2278_v25 = vld [vmem:[#allocation10 + $0x80] ss:$8 sps:$4 sm:$0xff] (!%p1955_p9)  }
  0x73   : > { %661 = vmatprep.mubr.bf16.mxu0 %v406_v17  ;;  %v422_v24 = vpack.c.bf16 %v376_v22, %v374_v20  ;;  %v2279_v26 = vld [vmem:[#allocation10 + $0x94] ss:$8 sps:$4 sm:$0xff]   ;;  %v2281_v27 = vld [vmem:[#allocation10 + $0x90] ss:$8 sps:$4 sm:$0xff]   ;;  %v2282_v28 = vld [vmem:[#allocation10 + $0xa4] ss:$8 sps:$4 sm:$0xff]  }
  0x74   : > { %v2284_v29 = vld [vmem:[#allocation10 + $0xa0] ss:$8 sps:$4 sm:$0xff]   ;;  %v2285_v30 = vld [vmem:[#allocation10 + $0xb4] ss:$8 sps:$4 sm:$0xff]   ;;  %v2287_v31 = vld [vmem:[#allocation10 + $0xb0] ss:$8 sps:$4 sm:$0xff]  }
  0x75   : > { %634 = vmatpush1.bf16.msra.mxu0 %v2260_v7  ;;  %2143 = vmatpush1.bf16.msra.mxu1 %v2260_v7  ;;  %v2288_v32 = vld [vmem:[#allocation10 + $0xc4] ss:$8 sps:$4 sm:$0xff]   ;;  %v2290_v33 = vld [vmem:[#allocation10 + $0xc0] ss:$8 sps:$4 sm:$0xff]   ;;  %v2291_v34 = vld [vmem:[#allocation10 + $0xd4] ss:$8 sps:$4 sm:$0xff]  }
  0x76   : > { %635 = vmatprep.subr.bf16.mxu0 %v2261_v8  ;;  %2128 = vmatprep.subr.bf16.mxu1 %v2261_v8  ;;  %v2293_v35 = vld [vmem:[#allocation10 + $0xd0] ss:$8 sps:$4 sm:$0xff]   ;;  %v2294_v36 = vld [vmem:[#allocation10 + $0xe4] ss:$8 sps:$4 sm:$0xff]   ;;  %v2296_v37 = vld [vmem:[#allocation10 + $0xe0] ss:$8 sps:$4 sm:$0xff]  }
  0x77   : > { %741 = vmatprep.mubr.bf16.mxu1 %v422_v24  ;;  %v2297_v38 = vld [vmem:[#allocation10 + $0xf4] ss:$8 sps:$4 sm:$0xff]   ;;  %v2299_v39 = vld [vmem:[#allocation10 + $0xf0] ss:$8 sps:$4 sm:$0xff]   ;;  %v346_v42 = vld [vmem:[#allocation7 + $0x28] sm:$0xff] }
  0x78   : > { %v343_v41 = vld [vmem:[#allocation7 + $0x10] sm:$0xff]  ;;  %v373_v43 = vld [vmem:[#allocation7 + $0x100] sm:$0xff]  ;;  %v348_v45 = vld [vmem:[#allocation7 + $0x38] sm:$0xff] }
  0x79   : > { %636 = vmatpush1.bf16.msra.mxu0 %v2263_v9  ;;  %2144 = vmatpush1.bf16.msra.mxu1 %v2263_v9  ;;  %v375_v44 = vld [vmem:[#allocation7 + $0x110] sm:$0xff]  ;;  %v378_v46 = vld [vmem:[#allocation7 + $0x128] sm:$0xff]  ;;  %v380_v47 = vld [vmem:[#allocation7 + $0x138] sm:$0xff]  ;;  %v405_v48 = vpack.c.bf16 %v343_v41, %v341_v40  ;;  %v408_v50 = vpack.c.bf16 %v348_v45, %v346_v42 }
  0x7a   : > { %637 = vmatprep.subr.bf16.mxu0 %v2264_v10  ;;  %2129 = vmatprep.subr.bf16.mxu1 %v2264_v10  ;;  %v421_v49 = vpack.c.bf16 %v375_v44, %v373_v43  ;;  %v424_v51 = vpack.c.bf16 %v380_v47, %v378_v46  ;;  %v345_v52 = vld [vmem:[#allocation7 + $0x20] sm:$0xff]  ;;  %v347_v53 = vld [vmem:[#allocation7 + $0x30] sm:$0xff]  ;;  %v350_v54 = vld [vmem:[#allocation7 + $0x48] sm:$0xff] }
  0x7b   : > { %v377_v55 = vld [vmem:[#allocation7 + $0x120] sm:$0xff]  ;;  %v379_v56 = vld [vmem:[#allocation7 + $0x130] sm:$0xff]  ;;  %v352_v57 = vld [vmem:[#allocation7 + $0x58] sm:$0xff]  ;;  %v407_v60 = vpack.c.bf16 %v347_v53, %v345_v52 }
  0x7c   : > { %v382_v58 = vld [vmem:[#allocation7 + $0x148] sm:$0xff]  ;;  %v384_v59 = vld [vmem:[#allocation7 + $0x158] sm:$0xff]  ;;  %v423_v61 = vpack.c.bf16 %v379_v56, %v377_v55  ;;  %v410_v62 = vpack.c.bf16 %v352_v57, %v350_v54  ;;  %v349_v0 = vld [vmem:[#allocation7 + $0x40] sm:$0xff] }
  0x7d   : > { %638 = vmatpush1.bf16.msra.mxu0 %v2266_v11  ;;  %2145 = vmatpush1.bf16.msra.mxu1 %v2266_v11  ;;  %v426_v63 = vpack.c.bf16 %v384_v59, %v382_v58  ;;  %v351_v1 = vld [vmem:[#allocation7 + $0x50] sm:$0xff]  ;;  %v354_v2 = vld [vmem:[#allocation7 + $0x68] sm:$0xff]  ;;  %v381_v3 = vld [vmem:[#allocation7 + $0x140] sm:$0xff] }
  0x7e   : > { %639 = vmatprep.subr.bf16.mxu0 %v2267_v12  ;;  %2130 = vmatprep.subr.bf16.mxu1 %v2267_v12  ;;  %v383_v4 = vld [vmem:[#allocation7 + $0x150] sm:$0xff]  ;;  %v356_v5 = vld [vmem:[#allocation7 + $0x78] sm:$0xff]  ;;  %v386_v6 = vld [vmem:[#allocation7 + $0x168] sm:$0xff]  ;;  %v409_v8 = vpack.c.bf16 %v351_v1, %v349_v0 }
  0x7f   : > { %v388_v7 = vld [vmem:[#allocation7 + $0x178] sm:$0xff]  ;;  %v425_v9 = vpack.c.bf16 %v383_v4, %v381_v3  ;;  %v412_v10 = vpack.c.bf16 %v356_v5, %v354_v2  ;;  %v353_v12 = vld [vmem:[#allocation7 + $0x60] sm:$0xff]  ;;  %v387_v16 = vld [vmem:[#allocation7 + $0x170] sm:$0xff] }
  0x80   : > { %v428_v11 = vpack.c.bf16 %v388_v7, %v386_v6  ;;  %v385_v15 = vld [vmem:[#allocation7 + $0x160] sm:$0xff]  ;;  %v360_v17 = vld [vmem:[#allocation7 + $0x98] sm:$0xff]  ;;  %v395_v40 = vld [vmem:[#allocation7 + $0x1b0] sm:$0xff] }
  0x81   : > { %640 = vmatpush1.bf16.msra.mxu0 %v2269_v13  ;;  %2146 = vmatpush1.bf16.msra.mxu1 %v2269_v13  ;;  %v355_v13 = vld [vmem:[#allocation7 + $0x70] sm:$0xff]  ;;  %v357_v24 = vld [vmem:[#allocation7 + $0x80] sm:$0xff]  ;;  %v368_v41 = vld [vmem:[#allocation7 + $0xd8] sm:$0xff] }
  0x82   : > { %641 = vmatprep.subr.bf16.mxu0 %v2270_v14  ;;  %2131 = vmatprep.subr.bf16.mxu1 %v2270_v14  ;;  %v358_v14 = vld [vmem:[#allocation7 + $0x88] sm:$0xff]  ;;  %v411_v20 = vpack.c.bf16 %v355_v13, %v353_v12  ;;  %v400_v43 = vld [vmem:[#allocation7 + $0x1d8] sm:$0xff]  ;;  %v399_v52 = vld [vmem:[#allocation7 + $0x1d0] sm:$0xff] }
  0x83   : > { %v414_v22 = vpack.c.bf16 %v360_v17, %v358_v14  ;;  %v398_v42 = vld [vmem:[#allocation7 + $0x1c8] sm:$0xff]  ;;  %v372_v53 = vld [vmem:[#allocation7 + $0xf8] sm:$0xff] }
  0x84   : > { %v434_v47 = vpack.c.bf16 %v400_v43, %v398_v42  ;;  %v402_v54 = vld [vmem:[#allocation7 + $0x1e8] sm:$0xff]  ;;  %v404_v55 = vld [vmem:[#allocation7 + $0x1f8] sm:$0xff] }
  0x85   : > { %642 = vmatpush1.bf16.msra.mxu0 %v2272_v18  ;;  %2147 = vmatpush1.bf16.msra.mxu1 %v2272_v18  ;;  %v390_v18 = vld [vmem:[#allocation7 + $0x188] sm:$0xff]  ;;  %v436_v59 = vpack.c.bf16 %v404_v55, %v402_v54 }
  0x86   : > { %643 = vmatprep.subr.bf16.mxu0 %v2273_v19  ;;  %2132 = vmatprep.subr.bf16.mxu1 %v2273_v19  ;;  %v392_v19 = vld [vmem:[#allocation7 + $0x198] sm:$0xff] }
  0x89   : > { %644 = vmatpush1.bf16.msra.mxu0 %v2275_v21  ;;  %2148 = vmatpush1.bf16.msra.mxu1 %v2275_v21  ;;  %v427_v21 = vpack.c.bf16 %v387_v16, %v385_v15 }
  0x8a   : > { %645 = vmatprep.subr.bf16.mxu0 %v2276_v23  ;;  %2133 = vmatprep.subr.bf16.mxu1 %v2276_v23  ;;  %v430_v23 = vpack.c.bf16 %v392_v19, %v390_v18 }
  0x8d   : > { %646 = vmatpush1.bf16.msra.mxu0 %v2278_v25  ;;  %2149 = vmatpush1.bf16.msra.mxu1 %v2278_v25  ;;  %v359_v25 = vld [vmem:[#allocation7 + $0x90] sm:$0xff] }
  0x8e   : > { %647 = vmatprep.subr.bf16.mxu0 %v2279_v26  ;;  %2134 = vmatprep.subr.bf16.mxu1 %v2279_v26  ;;  %v362_v26 = vld [vmem:[#allocation7 + $0xa8] sm:$0xff] }
  0x91   : > { %648 = vmatpush1.bf16.msra.mxu0 %v2281_v27  ;;  %2150 = vmatpush1.bf16.msra.mxu1 %v2281_v27  ;;  %v389_v27 = vld [vmem:[#allocation7 + $0x180] sm:$0xff] }
  0x92   : > { %649 = vmatprep.subr.bf16.mxu0 %v2282_v28  ;;  %2135 = vmatprep.subr.bf16.mxu1 %v2282_v28  ;;  %v391_v28 = vld [vmem:[#allocation7 + $0x190] sm:$0xff] }
  0x95   : > { %650 = vmatpush1.bf16.msra.mxu0 %v2284_v29  ;;  %2151 = vmatpush1.bf16.msra.mxu1 %v2284_v29  ;;  %v364_v29 = vld [vmem:[#allocation7 + $0xb8] sm:$0xff] }
  0x96   : > { %651 = vmatprep.subr.bf16.mxu0 %v2285_v30  ;;  %2136 = vmatprep.subr.bf16.mxu1 %v2285_v30  ;;  %v394_v30 = vld [vmem:[#allocation7 + $0x1a8] sm:$0xff] }
  0x99   : > { %652 = vmatpush1.bf16.msra.mxu0 %v2287_v31  ;;  %2152 = vmatpush1.bf16.msra.mxu1 %v2287_v31  ;;  %v396_v31 = vld [vmem:[#allocation7 + $0x1b8] sm:$0xff] }
  0x9a   : > { %653 = vmatprep.subr.bf16.mxu0 %v2288_v32  ;;  %2137 = vmatprep.subr.bf16.mxu1 %v2288_v32  ;;  %v413_v32 = vpack.c.bf16 %v359_v25, %v357_v24 }
  0x9d   : > { %654 = vmatpush1.bf16.msra.mxu0 %v2290_v33  ;;  %2153 = vmatpush1.bf16.msra.mxu1 %v2290_v33  ;;  %v429_v33 = vpack.c.bf16 %v391_v28, %v389_v27 }
  0x9e   : > { %655 = vmatprep.subr.bf16.mxu0 %v2291_v34  ;;  %2138 = vmatprep.subr.bf16.mxu1 %v2291_v34  ;;  %v416_v34 = vpack.c.bf16 %v364_v29, %v362_v26 }
  0xa1   : > { %656 = vmatpush1.bf16.msra.mxu0 %v2293_v35  ;;  %2154 = vmatpush1.bf16.msra.mxu1 %v2293_v35  ;;  %v432_v35 = vpack.c.bf16 %v396_v31, %v394_v30 }
  0xa2   : > { %657 = vmatprep.subr.bf16.mxu0 %v2294_v36  ;;  %2139 = vmatprep.subr.bf16.mxu1 %v2294_v36  ;;  %v361_v36 = vld [vmem:[#allocation7 + $0xa0] sm:$0xff] }
  0xa5   : > { %658 = vmatpush1.bf16.msra.mxu0 %v2296_v37  ;;  %2155 = vmatpush1.bf16.msra.mxu1 %v2296_v37  ;;  %v363_v37 = vld [vmem:[#allocation7 + $0xb0] sm:$0xff] }
  0xa6   : > { %659 = vmatprep.subr.bf16.mxu0 %v2297_v38  ;;  %2140 = vmatprep.subr.bf16.mxu1 %v2297_v38  ;;  %v366_v38 = vld [vmem:[#allocation7 + $0xc8] sm:$0xff]  ;;  %v415_v44 = vpack.c.bf16 %v363_v37, %v361_v36 }
  0xa7   : > { %v418_v46 = vpack.c.bf16 %v368_v41, %v366_v38 }
  0xa9   : > { %660 = vmatpush1.bf16.msra.mxu0 %v2299_v39  ;;  %2156 = vmatpush1.bf16.msra.mxu1 %v2299_v39  ;;  %v393_v39 = vld [vmem:[#allocation7 + $0x1a0] sm:$0xff] }
  0xaa   : > { %v431_v45 = vpack.c.bf16 %v395_v40, %v393_v39 }
  0xac   : > { %662 = vmatmul.mubr.bf16.vlgmr.msra.gmra.mrb[0].mxu0 %v405_v48  ;;  %742 = vmatmul.mubr.bf16.vlgmr.msra.gmra.mrb[0].mxu1 %v421_v49  ;;  %v365_v48 = vld [vmem:[#allocation7 + $0xc0] sm:$0xff]  ;;  %v367_v49 = vld [vmem:[#allocation7 + $0xd0] sm:$0xff] }
  0xad   : > { %671 = vmatprep.mubr.bf16.mxu0 %v408_v50  ;;  %751 = vmatprep.mubr.bf16.mxu1 %v424_v51  ;;  %v370_v50 = vld [vmem:[#allocation7 + $0xe8] sm:$0xff]  ;;  %v397_v51 = vld [vmem:[#allocation7 + $0x1c0] sm:$0xff]  ;;  %v417_v56 = vpack.c.bf16 %v367_v49, %v365_v48 }
  0xae   : > { %v433_v57 = vpack.c.bf16 %v399_v52, %v397_v51  ;;  %v420_v58 = vpack.c.bf16 %v372_v53, %v370_v50 }
  0xb4   : > { %672 = vmatmul.mubr.bf16.gmra.mrb[4].mxu0 %v407_v60  ;;  %752 = vmatmul.mubr.bf16.gmra.mrb[4].mxu1 %v423_v61  ;;  %v369_v60 = vld [vmem:[#allocation7 + $0xe0] sm:$0xff]  ;;  %v371_v61 = vld [vmem:[#allocation7 + $0xf0] sm:$0xff] }
  0xb5   : > { %681 = vmatprep.mubr.bf16.mxu0 %v410_v62  ;;  %761 = vmatprep.mubr.bf16.mxu1 %v426_v63  ;;  %v401_v62 = vld [vmem:[#allocation7 + $0x1e0] sm:$0xff]  ;;  %v403_v63 = vld [vmem:[#allocation7 + $0x1f0] sm:$0xff]  ;;  %v419_v0 = vpack.c.bf16 %v371_v61, %v369_v60 }
  0xb6   : > { %v435_v1 = vpack.c.bf16 %v403_v63, %v401_v62 }
  0xbc   : > { %682 = vmatmul.mubr.bf16.gmra.mrb[8].mxu0 %v409_v8  ;;  %762 = vmatmul.mubr.bf16.gmra.mrb[8].mxu1 %v425_v9 }
  0xbd   : > { %691 = vmatprep.mubr.bf16.mxu0 %v412_v10  ;;  %771 = vmatprep.mubr.bf16.mxu1 %v428_v11 }
  0xc4   : > { %692 = vmatmul.mubr.bf16.gmra.mrb[12].mxu0 %v411_v20  ;;  %772 = vmatmul.mubr.bf16.gmra.mrb[12].mxu1 %v427_v21 }
  0xc5   : > { %701 = vmatprep.mubr.bf16.mxu0 %v414_v22  ;;  %781 = vmatprep.mubr.bf16.mxu1 %v430_v23 }
  0xcc   : > { %702 = vmatmul.mubr.bf16.gmra.mrb[16].mxu0 %v413_v32  ;;  %782 = vmatmul.mubr.bf16.gmra.mrb[16].mxu1 %v429_v33 }
  0xcd   : > { %711 = vmatprep.mubr.bf16.mxu0 %v416_v34  ;;  %791 = vmatprep.mubr.bf16.mxu1 %v432_v35 }
  0xd4   : > { %712 = vmatmul.mubr.bf16.gmra.mrb[20].mxu0 %v415_v44  ;;  %792 = vmatmul.mubr.bf16.gmra.mrb[20].mxu1 %v431_v45 }
  0xd5   : > { %721 = vmatprep.mubr.bf16.mxu0 %v418_v46  ;;  %801 = vmatprep.mubr.bf16.mxu1 %v434_v47 }
  0xdc   : > { %722 = vmatmul.mubr.bf16.gmra.mrb[24].mxu0 %v417_v56  ;;  %802 = vmatmul.mubr.bf16.gmra.mrb[24].mxu1 %v433_v57 }
  0xdd   : > { %731 = vmatprep.mubr.bf16.mxu0 %v420_v58  ;;  %811 = vmatprep.mubr.bf16.mxu1 %v436_v59 }
  0xe4   : > { %732 = vmatmul.mubr.bf16.gmra.mrb[28].mxu0 %v419_v0  ;;  %812 = vmatmul.mubr.bf16.gmra.mrb[28].mxu1 %v435_v1 }
 0x17f   : > { %v663_v2 = vpop.f32.mrb[0].mxu0  ;;  %v2630_v3 = vpop.f32.mrb[0].mxu1 }
 0x180   : > { %828 = vst [vmem:[#allocation2] sm:$0xff] %v663_v2  ;;  %v665_v4 = vpop.f32.mrb[1].mxu0  ;;  %860 = vst [vmem:[#allocation2 + $0x100] sm:$0xff] %v2630_v3  ;;  %v2633_v5 = vpop.f32.mrb[1].mxu1  ;;  %v992_v8 = vmul.f32 %v663_v2, %v663_v2 }
 0x181   : > { %829 = vst [vmem:[#allocation2 + $0x8] sm:$0xff] %v665_v4  ;;  %v667_v6 = vpop.f32.mrb[2].mxu0  ;;  %861 = vst [vmem:[#allocation2 + $0x108] sm:$0xff] %v2633_v5  ;;  %v2636_v7 = vpop.f32.mrb[2].mxu1  ;;  %v993_v13 = vmul.f32 %v665_v4, %v665_v4 }
 0x182   : > { %830 = vst [vmem:[#allocation2 + $0x10] sm:$0xff] %v667_v6  ;;  %v893_v9 = vadd.f32 %v667_v6, %v663_v2  ;;  %v994_v10 = vmul.f32 %v667_v6, %v667_v6  ;;  %v669_v11 = vpop.f32.mrb[3].mxu0  ;;  %862 = vst [vmem:[#allocation2 + $0x110] sm:$0xff] %v2636_v7  ;;  %v2639_v12 = vpop.f32.mrb[3].mxu1 }
 0x183   : > { %831 = vst [vmem:[#allocation2 + $0x18] sm:$0xff] %v669_v11  ;;  %v930_v14 = vadd.f32 %v669_v11, %v665_v4  ;;  %v995_v15 = vmul.f32 %v669_v11, %v669_v11  ;;  %863 = vst [vmem:[#allocation2 + $0x118] sm:$0xff] %v2639_v12 }
 0x184   : > { %v1056_v16 = vadd.f32 %v994_v10, %v992_v8 }
 0x185   : > { %v1093_v17 = vadd.f32 %v995_v15, %v993_v13 }
 0x187   : > { %v673_v18 = vpop.f32.mrb[4].mxu0  ;;  %v2642_v19 = vpop.f32.mrb[4].mxu1 }
 0x188   : > { %832 = vst [vmem:[#allocation2 + $0x20] sm:$0xff] %v673_v18  ;;  %v894_v20 = vadd.f32 %v893_v9, %v673_v18  ;;  %v996_v21 = vmul.f32 %v673_v18, %v673_v18  ;;  %v675_v22 = vpop.f32.mrb[5].mxu0  ;;  %864 = vst [vmem:[#allocation2 + $0x120] sm:$0xff] %v2642_v19  ;;  %v2645_v23 = vpop.f32.mrb[5].mxu1 }
 0x189   : > { %833 = vst [vmem:[#allocation2 + $0x28] sm:$0xff] %v675_v22  ;;  %v931_v24 = vadd.f32 %v930_v14, %v675_v22  ;;  %v997_v25 = vmul.f32 %v675_v22, %v675_v22  ;;  %v677_v26 = vpop.f32.mrb[6].mxu0  ;;  %865 = vst [vmem:[#allocation2 + $0x128] sm:$0xff] %v2645_v23  ;;  %v2648_v27 = vpop.f32.mrb[6].mxu1 }
 0x18a   : > { %v1057_v28 = vadd.f32 %v1056_v16, %v996_v21  ;;  %834 = vst [vmem:[#allocation2 + $0x30] sm:$0xff] %v677_v26  ;;  %v895_v29 = vadd.f32 %v894_v20, %v677_v26  ;;  %v998_v30 = vmul.f32 %v677_v26, %v677_v26  ;;  %v679_v31 = vpop.f32.mrb[7].mxu0  ;;  %866 = vst [vmem:[#allocation2 + $0x130] sm:$0xff] %v2648_v27  ;;  %v2651_v32 = vpop.f32.mrb[7].mxu1 }
 0x18b   : > { %v1094_v33 = vadd.f32 %v1093_v17, %v997_v25  ;;  %835 = vst [vmem:[#allocation2 + $0x38] sm:$0xff] %v679_v31  ;;  %v932_v34 = vadd.f32 %v931_v24, %v679_v31  ;;  %v999_v35 = vmul.f32 %v679_v31, %v679_v31  ;;  %867 = vst [vmem:[#allocation2 + $0x138] sm:$0xff] %v2651_v32 }
 0x18c   : > { %v1058_v36 = vadd.f32 %v1057_v28, %v998_v30 }
 0x18d   : > { %v1095_v37 = vadd.f32 %v1094_v33, %v999_v35 }
 0x18f   : > { %v683_v38 = vpop.f32.mrb[8].mxu0  ;;  %v2654_v39 = vpop.f32.mrb[8].mxu1 }
 0x190   : > { %836 = vst [vmem:[#allocation2 + $0x40] sm:$0xff] %v683_v38  ;;  %v896_v40 = vadd.f32 %v895_v29, %v683_v38  ;;  %v1000_v41 = vmul.f32 %v683_v38, %v683_v38  ;;  %v685_v42 = vpop.f32.mrb[9].mxu0  ;;  %868 = vst [vmem:[#allocation2 + $0x140] sm:$0xff] %v2654_v39  ;;  %v2657_v43 = vpop.f32.mrb[9].mxu1 }
 0x191   : > { %837 = vst [vmem:[#allocation2 + $0x48] sm:$0xff] %v685_v42  ;;  %v933_v44 = vadd.f32 %v932_v34, %v685_v42  ;;  %v1001_v45 = vmul.f32 %v685_v42, %v685_v42  ;;  %v687_v46 = vpop.f32.mrb[10].mxu0  ;;  %869 = vst [vmem:[#allocation2 + $0x148] sm:$0xff] %v2657_v43  ;;  %v2660_v47 = vpop.f32.mrb[10].mxu1 }
 0x192   : > { %v1059_v48 = vadd.f32 %v1058_v36, %v1000_v41  ;;  %838 = vst [vmem:[#allocation2 + $0x50] sm:$0xff] %v687_v46  ;;  %v897_v49 = vadd.f32 %v896_v40, %v687_v46  ;;  %v1002_v50 = vmul.f32 %v687_v46, %v687_v46  ;;  %v689_v51 = vpop.f32.mrb[11].mxu0  ;;  %870 = vst [vmem:[#allocation2 + $0x150] sm:$0xff] %v2660_v47  ;;  %v2663_v52 = vpop.f32.mrb[11].mxu1 }
 0x193   : > { %v1096_v53 = vadd.f32 %v1095_v37, %v1001_v45  ;;  %839 = vst [vmem:[#allocation2 + $0x58] sm:$0xff] %v689_v51  ;;  %v934_v54 = vadd.f32 %v933_v44, %v689_v51  ;;  %v1003_v55 = vmul.f32 %v689_v51, %v689_v51  ;;  %871 = vst [vmem:[#allocation2 + $0x158] sm:$0xff] %v2663_v52 }
 0x194   : > { %v1060_v56 = vadd.f32 %v1059_v48, %v1002_v50 }
 0x195   : > { %v1097_v57 = vadd.f32 %v1096_v53, %v1003_v55 }
 0x197   : > { %v693_v58 = vpop.f32.mrb[12].mxu0  ;;  %v2666_v59 = vpop.f32.mrb[12].mxu1 }
 0x198   : > { %840 = vst [vmem:[#allocation2 + $0x60] sm:$0xff] %v693_v58  ;;  %v898_v60 = vadd.f32 %v897_v49, %v693_v58  ;;  %v1004_v61 = vmul.f32 %v693_v58, %v693_v58  ;;  %v695_v62 = vpop.f32.mrb[13].mxu0  ;;  %872 = vst [vmem:[#allocation2 + $0x160] sm:$0xff] %v2666_v59  ;;  %v2669_v63 = vpop.f32.mrb[13].mxu1 }
 0x199   : > { %841 = vst [vmem:[#allocation2 + $0x68] sm:$0xff] %v695_v62  ;;  %v935_v0 = vadd.f32 %v934_v54, %v695_v62  ;;  %v1005_v1 = vmul.f32 %v695_v62, %v695_v62  ;;  %v697_v2 = vpop.f32.mrb[14].mxu0  ;;  %873 = vst [vmem:[#allocation2 + $0x168] sm:$0xff] %v2669_v63  ;;  %v2672_v4 = vpop.f32.mrb[14].mxu1 }
 0x19a   : > { %v1061_v6 = vadd.f32 %v1060_v56, %v1004_v61  ;;  %842 = vst [vmem:[#allocation2 + $0x70] sm:$0xff] %v697_v2  ;;  %v899_v8 = vadd.f32 %v898_v60, %v697_v2  ;;  %v1006_v9 = vmul.f32 %v697_v2, %v697_v2  ;;  %v699_v10 = vpop.f32.mrb[15].mxu0  ;;  %874 = vst [vmem:[#allocation2 + $0x170] sm:$0xff] %v2672_v4  ;;  %v2675_v11 = vpop.f32.mrb[15].mxu1 }
 0x19b   : > { %v1098_v13 = vadd.f32 %v1097_v57, %v1005_v1  ;;  %843 = vst [vmem:[#allocation2 + $0x78] sm:$0xff] %v699_v10  ;;  %v936_v14 = vadd.f32 %v935_v0, %v699_v10  ;;  %v1007_v15 = vmul.f32 %v699_v10, %v699_v10  ;;  %875 = vst [vmem:[#allocation2 + $0x178] sm:$0xff] %v2675_v11 }
 0x19c   : > { %v1062_v16 = vadd.f32 %v1061_v6, %v1006_v9 }
 0x19d   : > { %v1099_v17 = vadd.f32 %v1098_v13, %v1007_v15 }
 0x19f   : > { %v703_v18 = vpop.f32.mrb[16].mxu0  ;;  %v2678_v20 = vpop.f32.mrb[16].mxu1 }
 0x1a0   : > { %844 = vst [vmem:[#allocation2 + $0x80] sm:$0xff] %v703_v18  ;;  %v900_v21 = vadd.f32 %v899_v8, %v703_v18  ;;  %v1008_v22 = vmul.f32 %v703_v18, %v703_v18  ;;  %v705_v24 = vpop.f32.mrb[17].mxu0  ;;  %876 = vst [vmem:[#allocation2 + $0x180] sm:$0xff] %v2678_v20  ;;  %v2681_v25 = vpop.f32.mrb[17].mxu1 }
 0x1a1   : > { %845 = vst [vmem:[#allocation2 + $0x88] sm:$0xff] %v705_v24  ;;  %v937_v26 = vadd.f32 %v936_v14, %v705_v24  ;;  %v1009_v28 = vmul.f32 %v705_v24, %v705_v24  ;;  %v707_v29 = vpop.f32.mrb[18].mxu0  ;;  %877 = vst [vmem:[#allocation2 + $0x188] sm:$0xff] %v2681_v25  ;;  %v2684_v30 = vpop.f32.mrb[18].mxu1 }
 0x1a2   : > { %v1063_v31 = vadd.f32 %v1062_v16, %v1008_v22  ;;  %846 = vst [vmem:[#allocation2 + $0x90] sm:$0xff] %v707_v29  ;;  %v901_v33 = vadd.f32 %v900_v21, %v707_v29  ;;  %v1010_v34 = vmul.f32 %v707_v29, %v707_v29  ;;  %v709_v35 = vpop.f32.mrb[19].mxu0  ;;  %878 = vst [vmem:[#allocation2 + $0x190] sm:$0xff] %v2684_v30  ;;  %v2687_v36 = vpop.f32.mrb[19].mxu1 }
 0x1a3   : > { %v1100_v37 = vadd.f32 %v1099_v17, %v1009_v28  ;;  %847 = vst [vmem:[#allocation2 + $0x98] sm:$0xff] %v709_v35  ;;  %v938_v38 = vadd.f32 %v937_v26, %v709_v35  ;;  %v1011_v40 = vmul.f32 %v709_v35, %v709_v35  ;;  %879 = vst [vmem:[#allocation2 + $0x198] sm:$0xff] %v2687_v36 }
 0x1a4   : > { %v1064_v41 = vadd.f32 %v1063_v31, %v1010_v34 }
 0x1a5   : > { %v1101_v42 = vadd.f32 %v1100_v37, %v1011_v40 }
 0x1a7   : > { %v713_v44 = vpop.f32.mrb[20].mxu0  ;;  %v2690_v45 = vpop.f32.mrb[20].mxu1 }
 0x1a8   : > { %848 = vst [vmem:[#allocation2 + $0xa0] sm:$0xff] %v713_v44  ;;  %v902_v46 = vadd.f32 %v901_v33, %v713_v44  ;;  %v1012_v48 = vmul.f32 %v713_v44, %v713_v44  ;;  %v715_v49 = vpop.f32.mrb[21].mxu0  ;;  %880 = vst [vmem:[#allocation2 + $0x1a0] sm:$0xff] %v2690_v45  ;;  %v2693_v50 = vpop.f32.mrb[21].mxu1 }
 0x1a9   : > { %849 = vst [vmem:[#allocation2 + $0xa8] sm:$0xff] %v715_v49  ;;  %v939_v51 = vadd.f32 %v938_v38, %v715_v49  ;;  %v1013_v53 = vmul.f32 %v715_v49, %v715_v49  ;;  %v717_v54 = vpop.f32.mrb[22].mxu0  ;;  %881 = vst [vmem:[#allocation2 + $0x1a8] sm:$0xff] %v2693_v50  ;;  %v2696_v55 = vpop.f32.mrb[22].mxu1 }
 0x1aa   : > { %v1065_v56 = vadd.f32 %v1064_v41, %v1012_v48  ;;  %850 = vst [vmem:[#allocation2 + $0xb0] sm:$0xff] %v717_v54  ;;  %v903_v57 = vadd.f32 %v902_v46, %v717_v54  ;;  %v1014_v58 = vmul.f32 %v717_v54, %v717_v54  ;;  %v719_v60 = vpop.f32.mrb[23].mxu0  ;;  %882 = vst [vmem:[#allocation2 + $0x1b0] sm:$0xff] %v2696_v55  ;;  %v2699_v61 = vpop.f32.mrb[23].mxu1 }
 0x1ab   : > { %v1102_v62 = vadd.f32 %v1101_v42, %v1013_v53  ;;  %851 = vst [vmem:[#allocation2 + $0xb8] sm:$0xff] %v719_v60  ;;  %v940_v0 = vadd.f32 %v939_v51, %v719_v60  ;;  %v1015_v1 = vmul.f32 %v719_v60, %v719_v60  ;;  %883 = vst [vmem:[#allocation2 + $0x1b8] sm:$0xff] %v2699_v61 }
 0x1ac   : > { %v1066_v2 = vadd.f32 %v1065_v56, %v1014_v58 }
 0x1ad   : > { %v1103_v6 = vadd.f32 %v1102_v62, %v1015_v1 }
 0x1af   : > { %v723_v8 = vpop.f32.mrb[24].mxu0  ;;  %v2702_v9 = vpop.f32.mrb[24].mxu1 }
 0x1b0   : > { %852 = vst [vmem:[#allocation2 + $0xc0] sm:$0xff] %v723_v8  ;;  %v904_v10 = vadd.f32 %v903_v57, %v723_v8  ;;  %v1016_v13 = vmul.f32 %v723_v8, %v723_v8  ;;  %v725_v14 = vpop.f32.mrb[25].mxu0  ;;  %884 = vst [vmem:[#allocation2 + $0x1c0] sm:$0xff] %v2702_v9  ;;  %v2705_v15 = vpop.f32.mrb[25].mxu1 }
 0x1b1   : > { %853 = vst [vmem:[#allocation2 + $0xc8] sm:$0xff] %v725_v14  ;;  %v941_v16 = vadd.f32 %v940_v0, %v725_v14  ;;  %v1017_v17 = vmul.f32 %v725_v14, %v725_v14  ;;  %v727_v18 = vpop.f32.mrb[26].mxu0  ;;  %885 = vst [vmem:[#allocation2 + $0x1c8] sm:$0xff] %v2705_v15  ;;  %v2708_v21 = vpop.f32.mrb[26].mxu1 }
 0x1b2   : > { %v1067_v22 = vadd.f32 %v1066_v2, %v1016_v13  ;;  %854 = vst [vmem:[#allocation2 + $0xd0] sm:$0xff] %v727_v18  ;;  %v905_v24 = vadd.f32 %v904_v10, %v727_v18  ;;  %v1018_v26 = vmul.f32 %v727_v18, %v727_v18  ;;  %v729_v28 = vpop.f32.mrb[27].mxu0  ;;  %886 = vst [vmem:[#allocation2 + $0x1d0] sm:$0xff] %v2708_v21  ;;  %v2711_v29 = vpop.f32.mrb[27].mxu1 }
 0x1b3   : > { %v1104_v31 = vadd.f32 %v1103_v6, %v1017_v17  ;;  %855 = vst [vmem:[#allocation2 + $0xd8] sm:$0xff] %v729_v28  ;;  %v942_v33 = vadd.f32 %v941_v16, %v729_v28  ;;  %v1019_v34 = vmul.f32 %v729_v28, %v729_v28  ;;  %887 = vst [vmem:[#allocation2 + $0x1d8] sm:$0xff] %v2711_v29 }
 0x1b4   : > { %v1068_v35 = vadd.f32 %v1067_v22, %v1018_v26  ;;  %v1024_v2 = vmul.f32 %v2630_v3, %v2630_v3  ;;  %v1025_v10 = vmul.f32 %v2633_v5, %v2633_v5  ;;  %v1026_v16 = vmul.f32 %v2636_v7, %v2636_v7 }
 0x1b5   : > { %v1105_v37 = vadd.f32 %v1104_v31, %v1019_v34  ;;  %v1027_v22 = vmul.f32 %v2639_v12, %v2639_v12 }
 0x1b7   : > { %v733_v38 = vpop.f32.mrb[28].mxu0  ;;  %v2714_v40 = vpop.f32.mrb[28].mxu1 }
 0x1b8   : > { %856 = vst [vmem:[#allocation2 + $0xe0] sm:$0xff] %v733_v38  ;;  %v906_v41 = vadd.f32 %v905_v24, %v733_v38  ;;  %v1020_v42 = vmul.f32 %v733_v38, %v733_v38  ;;  %v735_v44 = vpop.f32.mrb[29].mxu0  ;;  %888 = vst [vmem:[#allocation2 + $0x1e0] sm:$0xff] %v2714_v40  ;;  %v2717_v46 = vpop.f32.mrb[29].mxu1 }
 0x1b9   : > { %857 = vst [vmem:[#allocation2 + $0xe8] sm:$0xff] %v735_v44  ;;  %v943_v48 = vadd.f32 %v942_v33, %v735_v44  ;;  %v1021_v49 = vmul.f32 %v735_v44, %v735_v44  ;;  %v737_v51 = vpop.f32.mrb[30].mxu0  ;;  %889 = vst [vmem:[#allocation2 + $0x1e8] sm:$0xff] %v2717_v46  ;;  %v2720_v53 = vpop.f32.mrb[30].mxu1 }
 0x1ba   : > { %v1069_v54 = vadd.f32 %v1068_v35, %v1020_v42  ;;  %858 = vst [vmem:[#allocation2 + $0xf0] sm:$0xff] %v737_v51  ;;  %v907_v56 = vadd.f32 %v906_v41, %v737_v51  ;;  %v1022_v57 = vmul.f32 %v737_v51, %v737_v51  ;;  %v739_v58 = vpop.f32.mrb[31].mxu0  ;;  %890 = vst [vmem:[#allocation2 + $0x1f0] sm:$0xff] %v2720_v53  ;;  %v2723_v60 = vpop.f32.mrb[31].mxu1 }
 0x1bb   : > { %v1106_v62 = vadd.f32 %v1105_v37, %v1021_v49  ;;  %859 = vst [vmem:[#allocation2 + $0xf8] sm:$0xff] %v739_v58  ;;  %v944_v0 = vadd.f32 %v943_v48, %v739_v58  ;;  %v1023_v1 = vmul.f32 %v739_v58, %v739_v58  ;;  %891 = vst [vmem:[#allocation2 + $0x1f8] sm:$0xff] %v2723_v60 }
 0x1bc   : > { %v908_v6 = vadd.f32 %v907_v56, %v2630_v3  ;;  %v1070_v8 = vadd.f32 %v1069_v54, %v1022_v57  ;;  %v1028_v3 = vmul.f32 %v2642_v19, %v2642_v19 }
 0x1bd   : > { %v945_v13 = vadd.f32 %v944_v0, %v2633_v5  ;;  %v1107_v14 = vadd.f32 %v1106_v62, %v1023_v1  ;;  %v1029_v5 = vmul.f32 %v2645_v23, %v2645_v23 }
 0x1be   : > { %v909_v17 = vadd.f32 %v908_v6, %v2636_v7  ;;  %v1071_v18 = vadd.f32 %v1070_v8, %v1024_v2  ;;  %v1030_v7 = vmul.f32 %v2648_v27, %v2648_v27 }
 0x1bf   : > { %v946_v24 = vadd.f32 %v945_v13, %v2639_v12  ;;  %v1108_v26 = vadd.f32 %v1107_v14, %v1025_v10  ;;  %v1031_v12 = vmul.f32 %v2651_v32, %v2651_v32  ;;  %v1040_v13 = vmul.f32 %v2678_v20, %v2678_v20 }
 0x1c0   : > { %v910_v28 = vadd.f32 %v909_v17, %v2642_v19  ;;  %v1072_v31 = vadd.f32 %v1071_v18, %v1026_v16  ;;  %v1032_v19 = vmul.f32 %v2654_v39, %v2654_v39  ;;  %v1041_v16 = vmul.f32 %v2681_v25, %v2681_v25 }
 0x1c1   : > { %v947_v33 = vadd.f32 %v946_v24, %v2645_v23  ;;  %v1109_v34 = vadd.f32 %v1108_v26, %v1027_v22  ;;  %v1033_v23 = vmul.f32 %v2657_v43, %v2657_v43  ;;  %v1042_v22 = vmul.f32 %v2684_v30, %v2684_v30 }
 0x1c2   : > { %v911_v35 = vadd.f32 %v910_v28, %v2648_v27  ;;  %v1073_v37 = vadd.f32 %v1072_v31, %v1028_v3  ;;  %v1034_v27 = vmul.f32 %v2660_v47, %v2660_v47  ;;  %v1043_v26 = vmul.f32 %v2687_v36, %v2687_v36 }
 0x1c3   : > { %v948_v38 = vadd.f32 %v947_v33, %v2651_v32  ;;  %v1110_v41 = vadd.f32 %v1109_v34, %v1029_v5  ;;  %v1035_v32 = vmul.f32 %v2663_v52, %v2663_v52  ;;  %v1044_v28 = vmul.f32 %v2690_v45, %v2690_v45 }
 0x1c4   : > { %v1074_v42 = vadd.f32 %v1073_v37, %v1030_v7  ;;  %v912_v44 = vadd.f32 %v911_v35, %v2654_v39  ;;  %v1036_v39 = vmul.f32 %v2666_v59, %v2666_v59  ;;  %v1045_v5 = vmul.f32 %v2693_v50, %v2693_v50 }
 0x1c5   : > { %v1111_v48 = vadd.f32 %v1110_v41, %v1031_v12  ;;  %v949_v49 = vadd.f32 %v948_v38, %v2657_v43  ;;  %v1037_v43 = vmul.f32 %v2669_v63, %v2669_v63  ;;  %v1046_v34 = vmul.f32 %v2696_v55, %v2696_v55 }
 0x1c6   : > { %v913_v51 = vadd.f32 %v912_v44, %v2660_v47  ;;  %v1075_v54 = vadd.f32 %v1074_v42, %v1032_v19  ;;  %v1038_v47 = vmul.f32 %v2672_v4, %v2672_v4  ;;  %v1047_v35 = vmul.f32 %v2699_v61, %v2699_v61 }
 0x1c7   : > { %v950_v56 = vadd.f32 %v949_v49, %v2663_v52  ;;  %v1112_v57 = vadd.f32 %v1111_v48, %v1033_v23  ;;  %v1039_v52 = vmul.f32 %v2675_v11, %v2675_v11  ;;  %v1048_v12 = vmul.f32 %v2702_v9, %v2702_v9 }
 0x1c8   : > { %v914_v58 = vadd.f32 %v913_v51, %v2666_v59  ;;  %v1076_v62 = vadd.f32 %v1075_v54, %v1034_v27  ;;  %v1049_v41 = vmul.f32 %v2705_v15, %v2705_v15  ;;  %v1050_v42 = vmul.f32 %v2708_v21, %v2708_v21 }
 0x1c9   : > { %v951_v0 = vadd.f32 %v950_v56, %v2669_v63  ;;  %v1113_v1 = vadd.f32 %v1112_v57, %v1035_v32  ;;  %v1053_v48 = vmul.f32 %v2717_v46, %v2717_v46  ;;  %v1054_v32 = vmul.f32 %v2720_v53, %v2720_v53 }
 0x1ca   : > { %v915_v2 = vadd.f32 %v914_v58, %v2672_v4  ;;  %v1077_v6 = vadd.f32 %v1076_v62, %v1036_v39 }
 0x1cb   : > { %v952_v8 = vadd.f32 %v951_v0, %v2675_v11  ;;  %v1114_v10 = vadd.f32 %v1113_v1, %v1037_v43 }
 0x1cc   : > { %v916_v59 = vadd.f32 %v915_v2, %v2678_v20  ;;  %v1078_v14 = vadd.f32 %v1077_v6, %v1038_v47  ;;  %v973_v2 = vlaneseq }
 0x1cd   : > { %v953_v63 = vadd.f32 %v952_v8, %v2681_v25  ;;  %v1115_v17 = vadd.f32 %v1114_v10, %v1039_v52 }
 0x1ce   : > { %v1079_v4 = vadd.f32 %v1078_v14, %v1040_v13  ;;  %v917_v18 = vadd.f32 %v916_v59, %v2684_v30  ;;  %vm988_vm1 = vcmp.lt.s32.totalorder %v973_v2, 256 }
 0x1cf   : > { %v1116_v11 = vadd.f32 %v1115_v17, %v1041_v16  ;;  %v954_v24 = vadd.f32 %v953_v63, %v2687_v36 }
 0x1d0   : > { %v1080_v20 = vadd.f32 %v1079_v4, %v1042_v22  ;;  %v918_v3 = vadd.f32 %v917_v18, %v2690_v45 }
 0x1d1   : > { %v1117_v25 = vadd.f32 %v1116_v11, %v1043_v26  ;;  %v955_v31 = vadd.f32 %v954_v24, %v2693_v50 }
 0x1d2   : > { %v1081_v33 = vadd.f32 %v1080_v20, %v1044_v28  ;;  %v919_v30 = vadd.f32 %v918_v3, %v2696_v55 }
 0x1d3   : > { %v1118_v7 = vadd.f32 %v1117_v25, %v1045_v5  ;;  %v956_v36 = vadd.f32 %v955_v31, %v2699_v61  ;;  %v1052_v61 = vmul.f32 %v2714_v40, %v2714_v40 }
 0x1d4   : > { %v1082_v37 = vadd.f32 %v1081_v33, %v1046_v34  ;;  %v920_v45 = vadd.f32 %v919_v30, %v2702_v9  ;;  %v1051_v9 = vmul.f32 %v2711_v29, %v2711_v29  ;;  %v892_v30 = vld [vmem:[#allocation3] sm:$0x3] }
 0x1d5   : > { %v1119_v38 = vadd.f32 %v1118_v7, %v1047_v35  ;;  %v957_v50 = vadd.f32 %v956_v36, %v2705_v15  ;;  %v991_v36 = vld [vmem:[#allocation4] sm:$0x3] }
 0x1d6   : > { %v1083_v19 = vadd.f32 %v1082_v37, %v1048_v12  ;;  %v921_v55 = vadd.f32 %v920_v45, %v2708_v21 }
 0x1d7   : > { %v1120_v44 = vadd.f32 %v1119_v38, %v1049_v41  ;;  %v958_v23 = vadd.f32 %v957_v50, %v2711_v29  ;;  %v1055_v29 = vmul.f32 %v2723_v60, %v2723_v60 }
 0x1d8   : > { %v1084_v49 = vadd.f32 %v1083_v19, %v1050_v42  ;;  %v922_v15 = vadd.f32 %v921_v55, %v2714_v40 }
 0x1d9   : > { %v1121_v27 = vadd.f32 %v1120_v44, %v1051_v9  ;;  %v959_v51 = vadd.f32 %v958_v23, %v2717_v46  ;;  %v2474_v46 = vmov 1966171168  }
 0x1da   : > { %v1085_v54 = vadd.f32 %v1084_v49, %v1052_v61  ;;  %v923_v21 = vadd.f32 %v922_v15, %v2720_v53  ;;  %v971_v47 = vunpack.c.l.s4 %v2474_v46 }
 0x1db   : > { %v1122_v56 = vadd.f32 %v1121_v27, %v1053_v48  ;;  %v960_v57 = vadd.f32 %v959_v51, %v2723_v60  ;;  %v974_v60 = vshrl.u32 %v973_v2, 7 }
 0x1dc   : > { %v924_v39 = vrot.slane %v923_v21, 4  ;;  %v1086_v58 = vadd.f32 %v1085_v54, %v1054_v32  ;;  %v972_v63 = vunpack.c.0.s8 %v971_v47 }
 0x1dd   : > { %v961_v62 = vrot.slane %v960_v57, 4  ;;  %v1123_v43 = vadd.f32 %v1122_v56, %v1055_v29 }
 0x1de   : > { %v925_v40 = vadd.f32 %v924_v39, %v923_v21  ;;  %v1087_v0 = vrot.slane %v1086_v58, 4  ;;  %v975_v20 = vsub.s32 %v972_v63, %v974_v60 }
 0x1df   : > { %v962_v1 = vadd.f32 %v961_v62, %v960_v57  ;;  %v1124_v6 = vrot.slane %v1123_v43, 4 }
 0x1e0   : > { %v926_v52 = vrot.slane %v925_v40, 2  ;;  %v1088_v8 = vadd.f32 %v1087_v0, %v1086_v58 }
 0x1e1   : > { %v963_v53 = vrot.slane %v962_v1, 2  ;;  %v1125_v10 = vadd.f32 %v1124_v6, %v1123_v43 }
 0x1e2   : > { %v927_v59 = vadd.f32 %v926_v52, %v925_v40  ;;  %v1089_v13 = vrot.slane %v1088_v8, 2 }
 0x1e3   : > { %v964_v14 = vadd.f32 %v963_v53, %v962_v1  ;;  %v1126_v16 = vrot.slane %v1125_v10, 2 }
 0x1e4   : > { %v928_v17 = vrot.slane %v927_v59, 1  ;;  %v1090_v4 = vadd.f32 %v1089_v13, %v1088_v8 }
 0x1e5   : > { %v965_v18 = vrot.slane %v964_v14, 1  ;;  %v1127_v22 = vadd.f32 %v1126_v16, %v1125_v10 }
 0x1e6   : > { %v929_v11 = vadd.f32 %v928_v17, %v927_v59  ;;  %v1091_v24 = vrot.slane %v1090_v4, 1 }
 0x1e7   : > { %v966_v26 = vadd.f32 %v965_v18, %v964_v14  ;;  %v1128_v3 = vrot.slane %v1127_v22, 1 }
 0x1e8   : > { %v1092_v28 = vadd.f32 %v1091_v24, %v1090_v4 }
 0x1e9   : > { %v969_v25 = vcombine.low %v929_v11, %v966_v26  ;;  %v1129_v31 = vadd.f32 %v1128_v3, %v1127_v22 }
 0x1eb   : > { %v976_v5 = vrot.slane %v969_v25, %v975_v20  ;;  %v1132_v33 = vcombine.low %v1092_v28, %v1129_v31 }
 0x1ed   : > { %v983_v34 = vrot.slane %v976_v5, %v975_v20  ;;  %v1139_v7 = vrot.slane %v1132_v33, %v975_v20 }
 0x1ef   : > { %v985_v35 = vadd.f32 %v983_v34, %v892_v30  ;;  %v1146_v37 = vrot.slane %v1139_v7, %v975_v20 }
 0x1f1   : > { %990 = vst.msk [vmem:[#allocation3] sm:$0x3] %vm988_vm1, %v985_v35  ;;  %v1148_v45 = vadd.f32 %v1146_v37, %v991_v36 }
 0x1f3   : > { %1149 = vst.msk [vmem:[#allocation4] sm:$0x3] %vm988_vm1, %v1148_v45 }
 0x1f4 PF: > { %p1150_p10 = scmp.eq.s32.totalorder %s2454_s21, 1 }
 0x1f5   : > { %v1166_v44 = vlaneseq (%p1150_p10)  ;;  %v1162_v23 = vld [vmem:[%s3042_s2] sm:$0x3] (%p1150_p10) }
 0x1f6   : > { %1154 = sbr.rel (!%p1150_p10) target bundleno = 533 (0x215), region = 68  ;;  %v1171_v49 = vld [vmem:[%s3043_s3] sm:$0x3] (%p1150_p10) }
 0x1f7   : > { %vm1168_vm2 = vcmp.lt.s32.totalorder (%p1150_p10), %v1166_v44, 256 }
 0x1f8   : > { %v1155_v12 = vld [vmem:[#allocation3] sm:$0x3] (%p1150_p10) }
 0x1f9   : > { %v1156_v50 = vmul.f32 (%p1150_p10), 0.00390625, %v1155_v12 }
 0x1fa   : > { %v1157_v38 = vld [vmem:[#allocation4] sm:$0x3] (%p1150_p10) }
 0x1fb   : > { %v1158_v41 = vmul.f32 (%p1150_p10), 0.00390625, %v1157_v38  ;;  %v1159_v19 = vmul.f32 (%p1150_p10), %v1156_v50, %v1156_v50 }
 0x1fd   : > { %v1160_v55 = vsub.f32 %v1158_v41, %v1159_v19 }
 0x1ff   : > { %v1161_v42 = vmax.f32 %v1160_v55, 0.0 }
 0x201   : > { %v1163_v61 = vadd.f32 1e-05, %v1161_v42 }
 0x203   : > { %2300 = vrsqrt.f32 %v1163_v61 }
 0x20d   : > { %v2301_v9 = vpop.eup %2300 }
 0x20e   : > { %v1165_v48 = vmul.f32 %v2301_v9, %v1162_v23 }
 0x210   : > { %1170 = vst.msk [vmem:[#allocation5] sm:$0x3] %vm1168_vm2, %v1165_v48  ;;  %v1172_v15 = vmul.f32 %v1165_v48, %v1156_v50 }
 0x212   : > { %v1173_v27 = vsub.f32 %v1171_v49, %v1172_v15 }
 0x214   : > { %1174 = vst.msk [vmem:[#allocation6] sm:$0x3] %vm1168_vm2, %v1173_v27 }
 0x215 PF: > { %p1989_p11 = scmp.ne.s32.totalorder %s2454_s21, 1 }
 0x216   : > { %v2302_v51 = vld [vmem:[#allocation12 + $0x40] sm:$0xff] (!%p1989_p11)   ;;  %v2304_v21 = vld [vmem:[#allocation12 + $0x48] sm:$0xff] (!%p1989_p11)   ;;  %v2306_v56 = vld [vmem:[#allocation12 + $0x50] sm:$0xff] (!%p1989_p11)   ;;  %v1250_v57 = vlaneseq (!%p1989_p11) }
 0x217   : > { %1177 = sbr.rel (%p1989_p11) target bundleno = 843 (0x34b), region = 72  ;;  %v2303_v54 = vld [vmem:[#allocation12] sm:$0xff] (!%p1989_p11)   ;;  %2013 = vmatprep.subr.bf16.mxu0 (!%p1989_p11), %v2302_v51  ;;  %2157 = vmatprep.subr.bf16.mxu1 (!%p1989_p11), %v2302_v51  ;;  %v2305_v32 = vld [vmem:[#allocation12 + $0x8] sm:$0xff] (!%p1989_p11)   ;;  %v2307_v29 = vld [vmem:[#allocation12 + $0x10] sm:$0xff] (!%p1989_p11)  }
 0x218   : > { %2014 = vmatpush3.bf16.msra.mxu0 (!%p1989_p11), %v2303_v54  ;;  %2165 = vmatpush3.bf16.msra.mxu1 (!%p1989_p11), %v2303_v54  ;;  %v2308_v39 = vld [vmem:[#allocation12 + $0x58] sm:$0xff] (!%p1989_p11)   ;;  %v1251_v58 = vshrl.u32 (!%p1989_p11), %v1250_v57, 7  ;;  %v2310_v43 = vld [vmem:[#allocation12 + $0x60] sm:$0xff] (!%p1989_p11)   ;;  %v2312_v46 = vld [vmem:[#allocation12 + $0x68] sm:$0xff] (!%p1989_p11)  }
 0x219   : > { %2015 = vmatprep.subr.bf16.mxu0 (!%p1989_p11), %v2304_v21  ;;  %2158 = vmatprep.subr.bf16.mxu1 (!%p1989_p11), %v2304_v21  ;;  %v2309_v62 = vld [vmem:[#allocation12 + $0x18] sm:$0xff] (!%p1989_p11)   ;;  %v2311_v1 = vld [vmem:[#allocation12 + $0x20] sm:$0xff] (!%p1989_p11)   ;;  %v1187_v2 = vld [vmem:[#allocation2 + $0x18] sm:$0xff] (!%p1989_p11) }
 0x21a   : > { %v1252_v40 = vsub.s32 (!%p1989_p11), 0, %v1251_v58  ;;  %v1256_v0 = vsub.s32 (!%p1989_p11), 1, %v1251_v58  ;;  %v1185_v47 = vld [vmem:[#allocation2 + $0x8] sm:$0xff] (!%p1989_p11)  ;;  %v1248_v6 = vld [vmem:[#allocation5] sm:$0x3] (!%p1989_p11)  ;;  %v1219_v59 = vld [vmem:[#allocation2 + $0x118] sm:$0xff] (!%p1989_p11) }
 0x21b   : > { %v1324_v53 = vld [vmem:[#allocation6] sm:$0x3] (!%p1989_p11)  ;;  %v1217_v10 = vld [vmem:[#allocation2 + $0x108] sm:$0xff] (!%p1989_p11)  ;;  %v1186_v60 = vld [vmem:[#allocation2 + $0x10] sm:$0xff] (!%p1989_p11) }
 0x21c   : > { %2016 = vmatpush3.bf16.msra.mxu0 (!%p1989_p11), %v2305_v32  ;;  %2166 = vmatpush3.bf16.msra.mxu1 (!%p1989_p11), %v2305_v32  ;;  %v2830_v52 = vrot.slane (!%p1989_p11), %v1248_v6, %v1252_v40  ;;  %v2832_v8 = vrot.slane (!%p1989_p11), %v1248_v6, %v1256_v0  ;;  %v2834_v13 = vrot.slane (!%p1989_p11), %v1324_v53, %v1252_v40  ;;  %v1184_v63 = vld [vmem:[#allocation2] sm:$0xff] (!%p1989_p11)  ;;  %v2313_v17 = vld [vmem:[#allocation12 + $0x28] sm:$0xff] (!%p1989_p11)   ;;  %v2314_v24 = vld [vmem:[#allocation12 + $0x70] sm:$0xff] (!%p1989_p11)  }
 0x21d   : > { %2017 = vmatprep.subr.bf16.mxu0 (!%p1989_p11), %v2306_v56  ;;  %2159 = vmatprep.subr.bf16.mxu1 (!%p1989_p11), %v2306_v56  ;;  %v2836_v14 = vrot.slane (!%p1989_p11), %v1324_v53, %v1256_v0  ;;  %v1216_v16 = vld [vmem:[#allocation2 + $0x100] sm:$0xff] (!%p1989_p11)  ;;  %v1218_v11 = vld [vmem:[#allocation2 + $0x110] sm:$0xff] (!%p1989_p11)  ;;  %v1189_v36 = vld [vmem:[#allocation2 + $0x28] sm:$0xff] (!%p1989_p11) }
 0x21e   : > { %v1261_v4 = vmul.f32 %v2832_v8, %v1185_v47  ;;  %v1263_v18 = vmul.f32 %v2832_v8, %v1187_v2  ;;  %v1293_v22 = vmul.f32 %v2832_v8, %v1217_v10  ;;  %v1295_v26 = vmul.f32 %v2832_v8, %v1219_v59  ;;  %v1191_v35 = vld [vmem:[#allocation2 + $0x38] sm:$0xff]  ;;  %v1221_v41 = vld [vmem:[#allocation2 + $0x128] sm:$0xff]  ;;  %v2316_v19 = vld [vmem:[#allocation12 + $0x78] sm:$0xff]  }
 0x21f   : > { %v1260_v20 = vmul.f32 %v2830_v52, %v1184_v63  ;;  %v1262_v3 = vmul.f32 %v2830_v52, %v1186_v60  ;;  %v1292_v5 = vmul.f32 %v2830_v52, %v1216_v16  ;;  %v1294_v7 = vmul.f32 %v2830_v52, %v1218_v11  ;;  %v2315_v37 = vld [vmem:[#allocation12 + $0x30] sm:$0xff]   ;;  %v1188_v27 = vld [vmem:[#allocation2 + $0x20] sm:$0xff]  ;;  %v1190_v56 = vld [vmem:[#allocation2 + $0x30] sm:$0xff] }
 0x220   : > { %2018 = vmatpush3.bf16.msra.mxu0 %v2307_v29  ;;  %2167 = vmatpush3.bf16.msra.mxu1 %v2307_v29  ;;  %v1337_v28 = vadd.f32 %v2836_v14, %v1261_v4  ;;  %v1339_v25 = vadd.f32 %v2836_v14, %v1263_v18  ;;  %v1369_v31 = vadd.f32 %v2836_v14, %v1293_v22  ;;  %v1223_v23 = vld [vmem:[#allocation2 + $0x138] sm:$0xff]  ;;  %v2317_v57 = vld [vmem:[#allocation12 + $0x38] sm:$0xff]  }
 0x221   : > { %2019 = vmatprep.subr.bf16.mxu0 %v2308_v39  ;;  %2160 = vmatprep.subr.bf16.mxu1 %v2308_v39  ;;  %v1371_v33 = vadd.f32 %v2836_v14, %v1295_v26  ;;  %v1336_v30 = vadd.f32 %v2834_v13, %v1260_v20  ;;  %v1338_v34 = vadd.f32 %v2834_v13, %v1262_v3  ;;  %v1195_v10 = vld [vmem:[#allocation2 + $0x58] sm:$0xff] }
 0x222   : > { %v1401_v45 = vmax.f32 %v1337_v28, 0.0  ;;  %v1403_v12 = vmax.f32 %v1339_v25, 0.0  ;;  %v1433_v38 = vmax.f32 %v1369_v31, 0.0  ;;  %v1368_v50 = vadd.f32 %v2834_v13, %v1292_v5  ;;  %v1192_v25 = vld [vmem:[#allocation2 + $0x40] sm:$0xff] }
 0x223   : > { %v1435_v55 = vmax.f32 %v1371_v33, 0.0  ;;  %v1400_v42 = vmax.f32 %v1336_v30, 0.0  ;;  %v1402_v61 = vmax.f32 %v1338_v34, 0.0  ;;  %v1370_v44 = vadd.f32 %v2834_v13, %v1294_v7  ;;  %v1194_v34 = vld [vmem:[#allocation2 + $0x50] sm:$0xff] }
 0x224   : > { %2020 = vmatpush3.bf16.msra.mxu0 %v2309_v62  ;;  %2168 = vmatpush3.bf16.msra.mxu1 %v2309_v62  ;;  %v1465_v9 = vpack.c.bf16 %v1403_v12, %v1401_v45  ;;  %v1432_v48 = vmax.f32 %v1368_v50, 0.0  ;;  %v1265_v49 = vmul.f32 %v2832_v8, %v1189_v36  ;;  %v1267_v15 = vmul.f32 %v2832_v8, %v1191_v35  ;;  %v1220_v62 = vld [vmem:[#allocation2 + $0x120] sm:$0xff]  ;;  %v1226_v12 = vld [vmem:[#allocation2 + $0x150] sm:$0xff] }
 0x225   : > { %2021 = vmatprep.subr.bf16.mxu0 %v2310_v43  ;;  %2161 = vmatprep.subr.bf16.mxu1 %v2310_v43  ;;  %v1481_v51 = vpack.c.bf16 %v1435_v55, %v1433_v38  ;;  %v1464_v54 = vpack.c.bf16 %v1402_v61, %v1400_v42  ;;  %v1434_v21 = vmax.f32 %v1370_v44, 0.0  ;;  %v1297_v32 = vmul.f32 %v2832_v8, %v1221_v41  ;;  %v1222_v43 = vld [vmem:[#allocation2 + $0x130] sm:$0xff]  ;;  %v1224_v45 = vld [vmem:[#allocation2 + $0x140] sm:$0xff] }
 0x226   : > { %v1341_v29 = vadd.f32 %v2836_v14, %v1265_v49  ;;  %v1343_v39 = vadd.f32 %v2836_v14, %v1267_v15  ;;  %v1299_v58 = vmul.f32 %v2832_v8, %v1223_v23  ;;  %1663 = vmatprep.mubr.bf16.mxu0 %v1465_v9  ;;  %v1266_v53 = vmul.f32 %v2830_v52, %v1190_v56  ;;  %v1199_v23 = vld [vmem:[#allocation2 + $0x78] sm:$0xff] }
 0x227   : > { %v1480_v40 = vpack.c.bf16 %v1434_v21, %v1432_v48  ;;  %v1373_v0 = vadd.f32 %v2836_v14, %v1297_v32  ;;  %1727 = vmatprep.mubr.bf16.mxu1 %v1481_v51  ;;  %v1296_v60 = vmul.f32 %v2830_v52, %v1220_v62  ;;  %v1298_v16 = vmul.f32 %v2830_v52, %v1222_v43  ;;  %v1231_v56 = vld [vmem:[#allocation2 + $0x178] sm:$0xff]  ;;  %v1196_v62 = vld [vmem:[#allocation2 + $0x60] sm:$0xff] }
 0x228   : > { %2022 = vmatpush3.bf16.msra.mxu0 %v2311_v1  ;;  %2169 = vmatpush3.bf16.msra.mxu1 %v2311_v1  ;;  %v1264_v1 = vmul.f32 %v2830_v52, %v1188_v27  ;;  %v1405_v47 = vmax.f32 %v1341_v29, 0.0  ;;  %v1407_v2 = vmax.f32 %v1343_v39, 0.0  ;;  %v1375_v6 = vadd.f32 %v2836_v14, %v1299_v58  ;;  %v1229_v27 = vld [vmem:[#allocation2 + $0x168] sm:$0xff] }
 0x229   : > { %2023 = vmatprep.subr.bf16.mxu0 %v2312_v46  ;;  %2162 = vmatprep.subr.bf16.mxu1 %v2312_v46  ;;  %v1193_v46 = vld [vmem:[#allocation2 + $0x48] sm:$0xff]  ;;  %v1437_v59 = vmax.f32 %v1373_v0, 0.0  ;;  %v1342_v22 = vadd.f32 %v2834_v13, %v1266_v53  ;;  %v1372_v20 = vadd.f32 %v2834_v13, %v1296_v60  ;;  %v1374_v3 = vadd.f32 %v2834_v13, %v1298_v16  ;;  %v1228_v53 = vld [vmem:[#allocation2 + $0x160] sm:$0xff] }
 0x22a   : > { %v1340_v63 = vadd.f32 %v2834_v13, %v1264_v1  ;;  %v1467_v4 = vpack.c.bf16 %v1407_v2, %v1405_v47  ;;  %v1439_v18 = vmax.f32 %v1375_v6, 0.0  ;;  %v1269_v11 = vmul.f32 %v2832_v8, %v1193_v46  ;;  %v1198_v1 = vld [vmem:[#allocation2 + $0x70] sm:$0xff] }
 0x22b   : > { %v1271_v28 = vmul.f32 %v2832_v8, %v1195_v10  ;;  %v1406_v5 = vmax.f32 %v1342_v22, 0.0  ;;  %v1436_v7 = vmax.f32 %v1372_v20, 0.0  ;;  %v1438_v36 = vmax.f32 %v1374_v3, 0.0  ;;  %v1230_v10 = vld [vmem:[#allocation2 + $0x170] sm:$0xff] }
 0x22c   : > { %2024 = vmatpush3.bf16.msra.mxu0 %v2313_v17  ;;  %2170 = vmatpush3.bf16.msra.mxu1 %v2313_v17  ;;  %v1225_v17 = vld [vmem:[#allocation2 + $0x148] sm:$0xff]  ;;  %v1404_v26 = vmax.f32 %v1340_v63, 0.0  ;;  %v1483_v31 = vpack.c.bf16 %v1439_v18, %v1437_v59  ;;  %v1345_v33 = vadd.f32 %v2836_v14, %v1269_v11  ;;  %v1268_v41 = vmul.f32 %v2830_v52, %v1192_v25 }
 0x22d   : > { %2025 = vmatprep.subr.bf16.mxu0 %v2314_v24  ;;  %2163 = vmatprep.subr.bf16.mxu1 %v2314_v24  ;;  %v1227_v24 = vld [vmem:[#allocation2 + $0x158] sm:$0xff]  ;;  %v1301_v30 = vmul.f32 %v2832_v8, %v1225_v17  ;;  %v1347_v35 = vadd.f32 %v2836_v14, %v1271_v28  ;;  %v1270_v44 = vmul.f32 %v2830_v52, %v1194_v34  ;;  %v1201_v17 = vld [vmem:[#allocation2 + $0x88] sm:$0xff] }
 0x22e   : > { %v1409_v38 = vmax.f32 %v1345_v33, 0.0  ;;  %v1466_v55 = vpack.c.bf16 %v1406_v5, %v1404_v26  ;;  %v1344_v48 = vadd.f32 %v2834_v13, %v1268_v41  ;;  %v1300_v49 = vmul.f32 %v2830_v52, %v1224_v45  ;;  %v1233_v25 = vld [vmem:[#allocation2 + $0x188] sm:$0xff]  ;;  %v1235_v34 = vld [vmem:[#allocation2 + $0x198] sm:$0xff]  ;;  %v1200_v45 = vld [vmem:[#allocation2 + $0x80] sm:$0xff] }
 0x22f   : > { %v1377_v50 = vadd.f32 %v2836_v14, %v1301_v30  ;;  %v1411_v42 = vmax.f32 %v1347_v35, 0.0  ;;  %v1302_v15 = vmul.f32 %v2830_v52, %v1226_v12  ;;  %v1482_v51 = vpack.c.bf16 %v1438_v36, %v1436_v7 }
 0x230   : > { %2026 = vmatpush3.bf16.msra.mxu0 %v2315_v37  ;;  %2171 = vmatpush3.bf16.msra.mxu1 %v2315_v37  ;;  %v1303_v37 = vmul.f32 %v2832_v8, %v1227_v24  ;;  %v1346_v21 = vadd.f32 %v2834_v13, %v1270_v44  ;;  %v1376_v29 = vadd.f32 %v2834_v13, %v1300_v49  ;;  %v1408_v46 = vmax.f32 %v1344_v48, 0.0  ;;  %v1203_v24 = vld [vmem:[#allocation2 + $0x98] sm:$0xff]  ;;  %v1232_v44 = vld [vmem:[#allocation2 + $0x180] sm:$0xff] }
 0x231   : > { %2027 = vmatprep.subr.bf16.mxu0 %v2316_v19  ;;  %2164 = vmatprep.subr.bf16.mxu1 %v2316_v19  ;;  %v1197_v19 = vld [vmem:[#allocation2 + $0x68] sm:$0xff]  ;;  %v1441_v9 = vmax.f32 %v1377_v50, 0.0  ;;  %v1378_v39 = vadd.f32 %v2834_v13, %v1302_v15  ;;  %v1275_v58 = vmul.f32 %v2832_v8, %v1199_v23  ;;  %v1305_v0 = vmul.f32 %v2832_v8, %v1229_v27  ;;  %v1234_v23 = vld [vmem:[#allocation2 + $0x190] sm:$0xff] }
 0x232   : > { %v1379_v61 = vadd.f32 %v2836_v14, %v1303_v37  ;;  %v1273_v32 = vmul.f32 %v2832_v8, %v1197_v19  ;;  %v1410_v47 = vmax.f32 %v1346_v21, 0.0  ;;  %v1307_v6 = vmul.f32 %v2832_v8, %v1231_v56  ;;  %v1202_v19 = vld [vmem:[#allocation2 + $0x90] sm:$0xff]  ;;  %v1205_v27 = vld [vmem:[#allocation2 + $0xa8] sm:$0xff]  ;;  %v1207_v56 = vld [vmem:[#allocation2 + $0xb8] sm:$0xff] }
 0x233   : > { %v1351_v2 = vadd.f32 %v2836_v14, %v1275_v58  ;;  %v1440_v59 = vmax.f32 %v1376_v29, 0.0  ;;  %v1442_v63 = vmax.f32 %v1378_v39, 0.0  ;;  %v1381_v60 = vadd.f32 %v2836_v14, %v1305_v0 }
 0x234   : > { %2028 = vmatpush3.bf16.msra.mxu0 %v2317_v57  ;;  %2172 = vmatpush3.bf16.msra.mxu1 %v2317_v57  ;;  %v1469_v57 = vpack.c.bf16 %v1411_v42, %v1409_v38  ;;  %v1272_v16 = vmul.f32 %v2830_v52, %v1196_v62  ;;  %v1383_v22 = vadd.f32 %v2836_v14, %v1307_v6  ;;  %v1237_v62 = vld [vmem:[#allocation2 + $0x1a8] sm:$0xff] }
 0x235   : > { %v1415_v18 = vmax.f32 %v1351_v2, 0.0  ;;  %v1274_v11 = vmul.f32 %v2830_v52, %v1198_v1  ;;  %v1445_v26 = vmax.f32 %v1381_v60, 0.0  ;;  %v1304_v3 = vmul.f32 %v2830_v52, %v1228_v53  ;;  %v1204_v53 = vld [vmem:[#allocation2 + $0xa0] sm:$0xff] }
 0x236   : > { %v1348_v20 = vadd.f32 %v2834_v13, %v1272_v16  ;;  %v1306_v28 = vmul.f32 %v2830_v52, %v1230_v10  ;;  %v1447_v5 = vmax.f32 %v1383_v22, 0.0  ;;  %v1277_v30 = vmul.f32 %v2832_v8, %v1201_v17  ;;  %v1206_v16 = vld [vmem:[#allocation2 + $0xb0] sm:$0xff] }
 0x237   : > { %1664 = vmatmul.mubr.bf16.vlgmr.msra.gmra.mrb[0].mxu0 %v1464_v54  ;;  %1728 = vmatmul.mubr.bf16.vlgmr.msra.gmra.mrb[0].mxu1 %v1480_v40  ;;  %v1443_v54 = vmax.f32 %v1379_v61, 0.0  ;;  %v1349_v40 = vadd.f32 %v2836_v14, %v1273_v32  ;;  %v1350_v33 = vadd.f32 %v2834_v13, %v1274_v11  ;;  %v1484_v7 = vpack.c.bf16 %v1442_v63, %v1440_v59  ;;  %v1236_v11 = vld [vmem:[#allocation2 + $0x1a0] sm:$0xff] }
 0x238   : > { %1671 = vmatprep.mubr.bf16.mxu0 %v1467_v4  ;;  %1735 = vmatprep.mubr.bf16.mxu1 %v1483_v31  ;;  %v1468_v31 = vpack.c.bf16 %v1410_v47, %v1408_v46  ;;  %v1380_v36 = vadd.f32 %v2834_v13, %v1304_v3  ;;  %v1382_v35 = vadd.f32 %v2834_v13, %v1306_v28  ;;  %v1239_v46 = vld [vmem:[#allocation2 + $0x1b8] sm:$0xff] }
 0x239   : > { %v1485_v43 = vpack.c.bf16 %v1443_v54, %v1441_v9  ;;  %v1413_v4 = vmax.f32 %v1349_v40, 0.0  ;;  %v1279_v37 = vmul.f32 %v2832_v8, %v1203_v24  ;;  %v1487_v38 = vpack.c.bf16 %v1447_v5, %v1445_v26  ;;  %v1238_v24 = vld [vmem:[#allocation2 + $0x1b0] sm:$0xff] }
 0x23a   : > { %v1353_v50 = vadd.f32 %v2836_v14, %v1277_v30  ;;  %v1309_v41 = vmul.f32 %v2832_v8, %v1233_v25  ;;  %v1311_v61 = vmul.f32 %v2832_v8, %v1235_v34  ;;  %v1414_v9 = vmax.f32 %v1350_v33, 0.0  ;;  %v1209_v25 = vld [vmem:[#allocation2 + $0xc8] sm:$0xff]  ;;  %v1211_v34 = vld [vmem:[#allocation2 + $0xd8] sm:$0xff] }
 0x23b   : > { %v1471_v12 = vpack.c.bf16 %v1415_v18, %v1413_v4  ;;  %v1355_v42 = vadd.f32 %v2836_v14, %v1279_v37  ;;  %v1444_v48 = vmax.f32 %v1380_v36, 0.0  ;;  %v1276_v15 = vmul.f32 %v2830_v52, %v1200_v45  ;;  %v1241_v45 = vld [vmem:[#allocation2 + $0x1c8] sm:$0xff] }
 0x23c   : > { %v1385_v49 = vadd.f32 %v2836_v14, %v1309_v41  ;;  %v1417_v54 = vmax.f32 %v1353_v50, 0.0  ;;  %v1387_v21 = vadd.f32 %v2836_v14, %v1311_v61  ;;  %v1278_v32 = vmul.f32 %v2830_v52, %v1202_v19  ;;  %v1243_v19 = vld [vmem:[#allocation2 + $0x1d8] sm:$0xff] }
 0x23d   : > { %v1308_v39 = vmul.f32 %v2830_v52, %v1232_v44  ;;  %v1310_v58 = vmul.f32 %v2830_v52, %v1234_v23  ;;  %v1352_v40 = vadd.f32 %v2834_v13, %v1276_v15  ;;  %v1281_v1 = vmul.f32 %v2832_v8, %v1205_v27 }
 0x23e   : > { %v1449_v29 = vmax.f32 %v1385_v49, 0.0  ;;  %v1354_v0 = vadd.f32 %v2834_v13, %v1278_v32  ;;  %v1283_v6 = vmul.f32 %v2832_v8, %v1207_v56  ;;  %v1313_v60 = vmul.f32 %v2832_v8, %v1237_v62  ;;  %v1242_v32 = vld [vmem:[#allocation2 + $0x1d0] sm:$0xff] }
 0x23f   : > { %1672 = vmatmul.mubr.bf16.gmra.mrb[4].mxu0 %v1466_v55  ;;  %1736 = vmatmul.mubr.bf16.gmra.mrb[4].mxu1 %v1482_v51  ;;  %v1412_v55 = vmax.f32 %v1348_v20, 0.0  ;;  %v1446_v51 = vmax.f32 %v1382_v35, 0.0  ;;  %v1384_v47 = vadd.f32 %v2834_v13, %v1308_v39  ;;  %v1386_v2 = vadd.f32 %v2834_v13, %v1310_v58 }
 0x240   : > { %1679 = vmatprep.mubr.bf16.mxu0 %v1469_v57  ;;  %1743 = vmatprep.mubr.bf16.mxu1 %v1485_v43  ;;  %v1419_v57 = vmax.f32 %v1355_v42, 0.0  ;;  %v1451_v43 = vmax.f32 %v1387_v21, 0.0  ;;  %v1357_v63 = vadd.f32 %v2836_v14, %v1281_v1  ;;  %v1359_v18 = vadd.f32 %v2836_v14, %v1283_v6  ;;  %v1240_v21 = vld [vmem:[#allocation2 + $0x1c0] sm:$0xff]  ;;  %v1215_v1 = vld [vmem:[#allocation2 + $0xf8] sm:$0xff] }
 0x241   : > { %v1470_v10 = vpack.c.bf16 %v1414_v9, %v1412_v55  ;;  %v1486_v59 = vpack.c.bf16 %v1446_v51, %v1444_v48  ;;  %v1315_v22 = vmul.f32 %v2832_v8, %v1239_v46  ;;  %v1416_v26 = vmax.f32 %v1352_v40, 0.0  ;;  %v1208_v48 = vld [vmem:[#allocation2 + $0xc0] sm:$0xff] }
 0x242   : > { %v1473_v17 = vpack.c.bf16 %v1419_v57, %v1417_v54  ;;  %v1489_v4 = vpack.c.bf16 %v1451_v43, %v1449_v29  ;;  %v1418_v20 = vmax.f32 %v1354_v0, 0.0  ;;  %v1389_v3 = vadd.f32 %v2836_v14, %v1313_v60  ;;  %v1210_v54 = vld [vmem:[#allocation2 + $0xd0] sm:$0xff]  ;;  %v1213_v0 = vld [vmem:[#allocation2 + $0xe8] sm:$0xff] }
 0x243   : > { %v1280_v28 = vmul.f32 %v2830_v52, %v1204_v53  ;;  %v1450_v5 = vmax.f32 %v1386_v2, 0.0  ;;  %v1391_v33 = vadd.f32 %v2836_v14, %v1315_v22  ;;  %v1282_v30 = vmul.f32 %v2830_v52, %v1206_v16  ;;  %v1245_v53 = vld [vmem:[#allocation2 + $0x1e8] sm:$0xff]  ;;  %v1247_v16 = vld [vmem:[#allocation2 + $0x1f8] sm:$0xff] }
 0x244   : > { %v1423_v36 = vmax.f32 %v1359_v18, 0.0  ;;  %v1312_v35 = vmul.f32 %v2830_v52, %v1236_v11  ;;  %v1314_v37 = vmul.f32 %v2830_v52, %v1238_v24  ;;  %v1285_v41 = vmul.f32 %v2832_v8, %v1209_v25 }
 0x245   : > { %v1356_v50 = vadd.f32 %v2834_v13, %v1280_v28  ;;  %v1358_v55 = vadd.f32 %v2834_v13, %v1282_v30  ;;  %v1287_v61 = vmul.f32 %v2832_v8, %v1211_v34  ;;  %v1472_v44 = vpack.c.bf16 %v1418_v20, %v1416_v26 }
 0x246   : > { %v1388_v42 = vadd.f32 %v2834_v13, %v1312_v35  ;;  %v1390_v23 = vadd.f32 %v2834_v13, %v1314_v37  ;;  %v1317_v9 = vmul.f32 %v2832_v8, %v1241_v45  ;;  %v1361_v15 = vadd.f32 %v2836_v14, %v1285_v41  ;;  %v1244_v35 = vld [vmem:[#allocation2 + $0x1e0] sm:$0xff]  ;;  %v1246_v37 = vld [vmem:[#allocation2 + $0x1f0] sm:$0xff] }
 0x247   : > { %1680 = vmatmul.mubr.bf16.gmra.mrb[8].mxu0 %v1468_v31  ;;  %1744 = vmatmul.mubr.bf16.gmra.mrb[8].mxu1 %v1484_v7  ;;  %v1448_v31 = vmax.f32 %v1384_v47, 0.0  ;;  %v1421_v7 = vmax.f32 %v1357_v63, 0.0  ;;  %v1363_v27 = vadd.f32 %v2836_v14, %v1287_v61  ;;  %v1319_v51 = vmul.f32 %v2832_v8, %v1243_v19 }
 0x248   : > { %1687 = vmatprep.mubr.bf16.mxu0 %v1471_v12  ;;  %1751 = vmatprep.mubr.bf16.mxu1 %v1487_v38  ;;  %v1453_v12 = vmax.f32 %v1389_v3, 0.0  ;;  %v1455_v38 = vmax.f32 %v1391_v33, 0.0  ;;  %v1420_v29 = vmax.f32 %v1356_v50, 0.0  ;;  %v1393_v39 = vadd.f32 %v2836_v14, %v1317_v9 }
 0x249   : > { %v1488_v49 = vpack.c.bf16 %v1450_v5, %v1448_v31  ;;  %v1475_v56 = vpack.c.bf16 %v1423_v36, %v1421_v7  ;;  %v1422_v58 = vmax.f32 %v1358_v55, 0.0  ;;  %v1452_v62 = vmax.f32 %v1388_v42, 0.0  ;;  %v1212_v5 = vld [vmem:[#allocation2 + $0xe0] sm:$0xff]  ;;  %v1214_v36 = vld [vmem:[#allocation2 + $0xf0] sm:$0xff] }
 0x24a   : > { %v1491_v57 = vpack.c.bf16 %v1455_v38, %v1453_v12  ;;  %v1395_v43 = vadd.f32 %v2836_v14, %v1319_v51  ;;  %v1284_v40 = vmul.f32 %v2830_v52, %v1208_v48  ;;  %v1454_v46 = vmax.f32 %v1390_v23, 0.0 }
 0x24b   : > { %v1286_v47 = vmul.f32 %v2830_v52, %v1210_v54  ;;  %v1316_v2 = vmul.f32 %v2830_v52, %v1240_v21  ;;  %v1318_v6 = vmul.f32 %v2830_v52, %v1242_v32  ;;  %v1457_v63 = vmax.f32 %v1393_v39, 0.0 }
 0x24c   : > { %v1459_v60 = vmax.f32 %v1395_v43, 0.0  ;;  %v1360_v18 = vadd.f32 %v2834_v13, %v1284_v40  ;;  %v1321_v22 = vmul.f32 %v2832_v8, %v1245_v53  ;;  %v1323_v20 = vmul.f32 %v2832_v8, %v1247_v16 }
 0x24d   : > { %v1362_v11 = vadd.f32 %v2834_v13, %v1286_v47  ;;  %v1392_v24 = vadd.f32 %v2834_v13, %v1316_v2  ;;  %v1394_v26 = vadd.f32 %v2834_v13, %v1318_v6  ;;  %v1474_v3 = vpack.c.bf16 %v1422_v58, %v1420_v29 }
 0x24e   : > { %v1490_v28 = vpack.c.bf16 %v1454_v46, %v1452_v62  ;;  %v1493_v31 = vpack.c.bf16 %v1459_v60, %v1457_v63  ;;  %v1397_v34 = vadd.f32 %v2836_v14, %v1321_v22  ;;  %v1399_v7 = vadd.f32 %v2836_v14, %v1323_v20 }
 0x24f   : > { %1688 = vmatmul.mubr.bf16.gmra.mrb[12].mxu0 %v1470_v10  ;;  %1752 = vmatmul.mubr.bf16.gmra.mrb[12].mxu1 %v1486_v59  ;;  %v1425_v10 = vmax.f32 %v1361_v15, 0.0  ;;  %v1427_v59 = vmax.f32 %v1363_v27, 0.0  ;;  %v1424_v45 = vmax.f32 %v1360_v18, 0.0  ;;  %v1426_v12 = vmax.f32 %v1362_v11, 0.0 }
 0x250   : > { %1695 = vmatprep.mubr.bf16.mxu0 %v1473_v17  ;;  %1759 = vmatprep.mubr.bf16.mxu1 %v1489_v4  ;;  %v1289_v17 = vmul.f32 %v2832_v8, %v1213_v0  ;;  %v1291_v4 = vmul.f32 %v2832_v8, %v1215_v1  ;;  %v1456_v38 = vmax.f32 %v1392_v24, 0.0  ;;  %v1458_v8 = vmax.f32 %v1394_v26, 0.0 }
 0x251   : > { %v1477_v25 = vpack.c.bf16 %v1427_v59, %v1425_v10  ;;  %v1288_v50 = vmul.f32 %v2830_v52, %v1212_v5  ;;  %v1290_v41 = vmul.f32 %v2830_v52, %v1214_v36  ;;  %v1320_v19 = vmul.f32 %v2830_v52, %v1244_v35 }
 0x252   : > { %v1365_v33 = vadd.f32 %v2836_v14, %v1289_v17  ;;  %v1367_v30 = vadd.f32 %v2836_v14, %v1291_v4  ;;  %v1322_v55 = vmul.f32 %v2830_v52, %v1246_v37  ;;  %v1461_v61 = vmax.f32 %v1397_v34, 0.0 }
 0x253   : > { %v1476_v23 = vpack.c.bf16 %v1426_v12, %v1424_v45  ;;  %v1492_v9 = vpack.c.bf16 %v1458_v8, %v1456_v38  ;;  %v1364_v48 = vadd.f32 %v2834_v13, %v1288_v50  ;;  %v1396_v15 = vadd.f32 %v2834_v13, %v1320_v19 }
 0x254   : > { %v1429_v14 = vmax.f32 %v1365_v33, 0.0  ;;  %v1431_v42 = vmax.f32 %v1367_v30, 0.0  ;;  %v1398_v27 = vadd.f32 %v2834_v13, %v1322_v55 }
 0x255   : > { %v1428_v52 = vmax.f32 %v1364_v48, 0.0  ;;  %v1460_v32 = vmax.f32 %v1396_v15, 0.0 }
 0x256   : > { %v1479_v51 = vpack.c.bf16 %v1431_v42, %v1429_v14 }
 0x257   : > { %1696 = vmatmul.mubr.bf16.gmra.mrb[16].mxu0 %v1472_v44  ;;  %1760 = vmatmul.mubr.bf16.gmra.mrb[16].mxu1 %v1488_v49  ;;  %v1463_v44 = vmax.f32 %v1399_v7, 0.0  ;;  %v1366_v49 = vadd.f32 %v2834_v13, %v1290_v41  ;;  %v2969_v13 = vld [vmem:[%s3045_s5] ss:$0 sm:$0xff] }
 0x258   : > { %1703 = vmatprep.mubr.bf16.mxu0 %v1475_v56  ;;  %1767 = vmatprep.mubr.bf16.mxu1 %v1491_v57  ;;  %v1462_v56 = vmax.f32 %v1398_v27, 0.0 }
 0x259   : > { %v1495_v54 = vpack.c.bf16 %v1463_v44, %v1461_v61  ;;  %v1430_v21 = vmax.f32 %v1366_v49, 0.0 }
 0x25a   : > { %v1494_v29 = vpack.c.bf16 %v1462_v56, %v1460_v32 }
 0x25b   : > { %v1478_v57 = vpack.c.bf16 %v1430_v21, %v1428_v52 }
 0x25f   : > { %1704 = vmatmul.mubr.bf16.gmra.mrb[20].mxu0 %v1474_v3  ;;  %1768 = vmatmul.mubr.bf16.gmra.mrb[20].mxu1 %v1490_v28 }
 0x260   : > { %1711 = vmatprep.mubr.bf16.mxu0 %v1477_v25  ;;  %1775 = vmatprep.mubr.bf16.mxu1 %v1493_v31 }
 0x267   : > { %1712 = vmatmul.mubr.bf16.gmra.mrb[24].mxu0 %v1476_v23  ;;  %1776 = vmatmul.mubr.bf16.gmra.mrb[24].mxu1 %v1492_v9 }
 0x268   : > { %1719 = vmatprep.mubr.bf16.mxu0 %v1479_v51  ;;  %1783 = vmatprep.mubr.bf16.mxu1 %v1495_v54 }
 0x26f   : > { %1720 = vmatmul.mubr.bf16.gmra.mrb[28].mxu0 %v1478_v57  ;;  %1784 = vmatmul.mubr.bf16.gmra.mrb[28].mxu1 %v1494_v29 }
 0x30a   : > { %v2029_v39 = vpop.f32.mrb[0].mxu0  ;;  %v2077_v58 = vpop.f32.mrb[0].mxu1 }
 0x30b   : > { %v2030_v62 = vpop.f32.mrb[1].mxu0  ;;  %v2078_v43 = vpop.f32.mrb[1].mxu1 }
 0x30c   : > { %v2031_v40 = vadd.f32 %v2030_v62, %v2029_v39  ;;  %v2079_v0 = vadd.f32 %v2078_v43, %v2077_v58  ;;  %v2032_v1 = vpop.f32.mrb[2].mxu0  ;;  %v2080_v46 = vpop.f32.mrb[2].mxu1 }
 0x30d   : > { %v2033_v47 = vpop.f32.mrb[3].mxu0  ;;  %v2081_v2 = vpop.f32.mrb[3].mxu1 }
 0x30e   : > { %v1666_v6 = vadd.f32 %v2031_v40, %v2969_v13  ;;  %v1730_v53 = vadd.f32 %v2079_v0, %v2969_v13  ;;  %v2034_v10 = vadd.f32 %v2033_v47, %v2032_v1  ;;  %v2082_v59 = vadd.f32 %v2081_v2, %v2080_v46 }
 0x310   : > { %1792 = vst [vmem:[#allocation13] sm:$0xff] %v1666_v6  ;;  %1808 = vst [vmem:[#allocation13 + $0x80] sm:$0xff] %v1730_v53  ;;  %v1669_v63 = vadd.f32 %v2034_v10, %v2969_v13  ;;  %v1733_v60 = vadd.f32 %v2082_v59, %v2969_v13 }
 0x312   : > { %1793 = vst [vmem:[#allocation13 + $0x8] sm:$0xff] %v1669_v63  ;;  %1809 = vst [vmem:[#allocation13 + $0x88] sm:$0xff] %v1733_v60  ;;  %v2035_v16 = vpop.f32.mrb[4].mxu0  ;;  %v2083_v17 = vpop.f32.mrb[4].mxu1 }
 0x313   : > { %v2036_v4 = vpop.f32.mrb[5].mxu0  ;;  %v2084_v18 = vpop.f32.mrb[5].mxu1 }
 0x314   : > { %v2037_v22 = vadd.f32 %v2036_v4, %v2035_v16  ;;  %v2085_v11 = vadd.f32 %v2084_v18, %v2083_v17  ;;  %v2038_v24 = vpop.f32.mrb[6].mxu0  ;;  %v2086_v26 = vpop.f32.mrb[6].mxu1 }
 0x315   : > { %v2039_v20 = vpop.f32.mrb[7].mxu0  ;;  %v2087_v3 = vpop.f32.mrb[7].mxu1 }
 0x316   : > { %v1674_v28 = vadd.f32 %v2037_v22, %v2969_v13  ;;  %v1738_v25 = vadd.f32 %v2085_v11, %v2969_v13  ;;  %v2040_v31 = vadd.f32 %v2039_v20, %v2038_v24  ;;  %v2088_v5 = vadd.f32 %v2087_v3, %v2086_v26 }
 0x318   : > { %1794 = vst [vmem:[#allocation13 + $0x10] sm:$0xff] %v1674_v28  ;;  %1810 = vst [vmem:[#allocation13 + $0x90] sm:$0xff] %v1738_v25  ;;  %v1677_v33 = vadd.f32 %v2040_v31, %v2969_v13  ;;  %v1741_v30 = vadd.f32 %v2088_v5, %v2969_v13 }
 0x31a   : > { %1795 = vst [vmem:[#allocation13 + $0x18] sm:$0xff] %v1677_v33  ;;  %1811 = vst [vmem:[#allocation13 + $0x98] sm:$0xff] %v1741_v30  ;;  %v2041_v34 = vpop.f32.mrb[8].mxu0  ;;  %v2089_v7 = vpop.f32.mrb[8].mxu1 }
 0x31b   : > { %v2042_v36 = vpop.f32.mrb[9].mxu0  ;;  %v2090_v35 = vpop.f32.mrb[9].mxu1 }
 0x31c   : > { %v2043_v37 = vadd.f32 %v2042_v36, %v2041_v34  ;;  %v2091_v45 = vadd.f32 %v2090_v35, %v2089_v7  ;;  %v2044_v12 = vpop.f32.mrb[10].mxu0  ;;  %v2092_v38 = vpop.f32.mrb[10].mxu1 }
 0x31d   : > { %v2045_v8 = vpop.f32.mrb[11].mxu0  ;;  %v2093_v50 = vpop.f32.mrb[11].mxu1 }
 0x31e   : > { %v1682_v41 = vadd.f32 %v2043_v37, %v2969_v13  ;;  %v1746_v19 = vadd.f32 %v2091_v45, %v2969_v13  ;;  %v2046_v55 = vadd.f32 %v2045_v8, %v2044_v12  ;;  %v2094_v14 = vadd.f32 %v2093_v50, %v2092_v38 }
 0x320   : > { %1796 = vst [vmem:[#allocation13 + $0x20] sm:$0xff] %v1682_v41  ;;  %1812 = vst [vmem:[#allocation13 + $0xa0] sm:$0xff] %v1746_v19  ;;  %v1685_v42 = vadd.f32 %v2046_v55, %v2969_v13  ;;  %v1749_v61 = vadd.f32 %v2094_v14, %v2969_v13 }
 0x322   : > { %1797 = vst [vmem:[#allocation13 + $0x28] sm:$0xff] %v1685_v42  ;;  %1813 = vst [vmem:[#allocation13 + $0xa8] sm:$0xff] %v1749_v61  ;;  %v2047_v44 = vpop.f32.mrb[12].mxu0  ;;  %v2095_v23 = vpop.f32.mrb[12].mxu1 }
 0x323   : > { %v2048_v9 = vpop.f32.mrb[13].mxu0  ;;  %v2096_v48 = vpop.f32.mrb[13].mxu1 }
 0x324   : > { %v2049_v49 = vadd.f32 %v2048_v9, %v2047_v44  ;;  %v2097_v15 = vadd.f32 %v2096_v48, %v2095_v23  ;;  %v2050_v27 = vpop.f32.mrb[14].mxu0  ;;  %v2098_v51 = vpop.f32.mrb[14].mxu1 }
 0x325   : > { %v2051_v54 = vpop.f32.mrb[15].mxu0  ;;  %v2099_v52 = vpop.f32.mrb[15].mxu1 }
 0x326   : > { %v1690_v21 = vadd.f32 %v2049_v49, %v2969_v13  ;;  %v1754_v32 = vadd.f32 %v2097_v15, %v2969_v13  ;;  %v2052_v56 = vadd.f32 %v2051_v54, %v2050_v27  ;;  %v2100_v57 = vadd.f32 %v2099_v52, %v2098_v51 }
 0x328   : > { %1798 = vst [vmem:[#allocation13 + $0x30] sm:$0xff] %v1690_v21  ;;  %1814 = vst [vmem:[#allocation13 + $0xb0] sm:$0xff] %v1754_v32  ;;  %v1693_v29 = vadd.f32 %v2052_v56, %v2969_v13  ;;  %v1757_v39 = vadd.f32 %v2100_v57, %v2969_v13 }
 0x32a   : > { %1799 = vst [vmem:[#allocation13 + $0x38] sm:$0xff] %v1693_v29  ;;  %1815 = vst [vmem:[#allocation13 + $0xb8] sm:$0xff] %v1757_v39  ;;  %v2053_v58 = vpop.f32.mrb[16].mxu0  ;;  %v2101_v62 = vpop.f32.mrb[16].mxu1 }
 0x32b   : > { %v2054_v43 = vpop.f32.mrb[17].mxu0  ;;  %v2102_v40 = vpop.f32.mrb[17].mxu1 }
 0x32c   : > { %v2055_v0 = vadd.f32 %v2054_v43, %v2053_v58  ;;  %v2103_v1 = vadd.f32 %v2102_v40, %v2101_v62  ;;  %v2056_v46 = vpop.f32.mrb[18].mxu0  ;;  %v2104_v47 = vpop.f32.mrb[18].mxu1 }
 0x32d   : > { %v2057_v2 = vpop.f32.mrb[19].mxu0  ;;  %v2105_v6 = vpop.f32.mrb[19].mxu1 }
 0x32e   : > { %v1698_v53 = vadd.f32 %v2055_v0, %v2969_v13  ;;  %v1762_v10 = vadd.f32 %v2103_v1, %v2969_v13  ;;  %v2058_v59 = vadd.f32 %v2057_v2, %v2056_v46  ;;  %v2106_v63 = vadd.f32 %v2105_v6, %v2104_v47 }
 0x330   : > { %1800 = vst [vmem:[#allocation13 + $0x40] sm:$0xff] %v1698_v53  ;;  %1816 = vst [vmem:[#allocation13 + $0xc0] sm:$0xff] %v1762_v10  ;;  %v1701_v60 = vadd.f32 %v2058_v59, %v2969_v13  ;;  %v1765_v16 = vadd.f32 %v2106_v63, %v2969_v13 }
 0x332   : > { %1801 = vst [vmem:[#allocation13 + $0x48] sm:$0xff] %v1701_v60  ;;  %1817 = vst [vmem:[#allocation13 + $0xc8] sm:$0xff] %v1765_v16  ;;  %v2059_v17 = vpop.f32.mrb[20].mxu0  ;;  %v2107_v4 = vpop.f32.mrb[20].mxu1 }
 0x333   : > { %v2060_v18 = vpop.f32.mrb[21].mxu0  ;;  %v2108_v22 = vpop.f32.mrb[21].mxu1 }
 0x334   : > { %v2061_v11 = vadd.f32 %v2060_v18, %v2059_v17  ;;  %v2109_v24 = vadd.f32 %v2108_v22, %v2107_v4  ;;  %v2062_v26 = vpop.f32.mrb[22].mxu0  ;;  %v2110_v20 = vpop.f32.mrb[22].mxu1 }
 0x335   : > { %v2063_v3 = vpop.f32.mrb[23].mxu0  ;;  %v2111_v28 = vpop.f32.mrb[23].mxu1 }
 0x336   : > { %v1706_v25 = vadd.f32 %v2061_v11, %v2969_v13  ;;  %v1770_v31 = vadd.f32 %v2109_v24, %v2969_v13  ;;  %v2064_v5 = vadd.f32 %v2063_v3, %v2062_v26  ;;  %v2112_v33 = vadd.f32 %v2111_v28, %v2110_v20 }
 0x338   : > { %1802 = vst [vmem:[#allocation13 + $0x50] sm:$0xff] %v1706_v25  ;;  %1818 = vst [vmem:[#allocation13 + $0xd0] sm:$0xff] %v1770_v31  ;;  %v1709_v30 = vadd.f32 %v2064_v5, %v2969_v13  ;;  %v1773_v34 = vadd.f32 %v2112_v33, %v2969_v13 }
 0x33a   : > { %1803 = vst [vmem:[#allocation13 + $0x58] sm:$0xff] %v1709_v30  ;;  %1819 = vst [vmem:[#allocation13 + $0xd8] sm:$0xff] %v1773_v34  ;;  %v2065_v7 = vpop.f32.mrb[24].mxu0  ;;  %v2113_v36 = vpop.f32.mrb[24].mxu1 }
 0x33b   : > { %v2066_v35 = vpop.f32.mrb[25].mxu0  ;;  %v2114_v37 = vpop.f32.mrb[25].mxu1 }
 0x33c   : > { %v2067_v45 = vadd.f32 %v2066_v35, %v2065_v7  ;;  %v2115_v12 = vadd.f32 %v2114_v37, %v2113_v36  ;;  %v2068_v38 = vpop.f32.mrb[26].mxu0  ;;  %v2116_v8 = vpop.f32.mrb[26].mxu1 }
 0x33d   : > { %v2069_v50 = vpop.f32.mrb[27].mxu0  ;;  %v2117_v41 = vpop.f32.mrb[27].mxu1 }
 0x33e   : > { %v1714_v19 = vadd.f32 %v2067_v45, %v2969_v13  ;;  %v1778_v55 = vadd.f32 %v2115_v12, %v2969_v13  ;;  %v2070_v14 = vadd.f32 %v2069_v50, %v2068_v38  ;;  %v2118_v42 = vadd.f32 %v2117_v41, %v2116_v8 }
 0x340   : > { %1804 = vst [vmem:[#allocation13 + $0x60] sm:$0xff] %v1714_v19  ;;  %1820 = vst [vmem:[#allocation13 + $0xe0] sm:$0xff] %v1778_v55  ;;  %v1717_v61 = vadd.f32 %v2070_v14, %v2969_v13  ;;  %v1781_v44 = vadd.f32 %v2118_v42, %v2969_v13 }
 0x342   : > { %1805 = vst [vmem:[#allocation13 + $0x68] sm:$0xff] %v1717_v61  ;;  %1821 = vst [vmem:[#allocation13 + $0xe8] sm:$0xff] %v1781_v44  ;;  %v2071_v23 = vpop.f32.mrb[28].mxu0  ;;  %v2119_v9 = vpop.f32.mrb[28].mxu1 }
 0x343   : > { %v2072_v48 = vpop.f32.mrb[29].mxu0  ;;  %v2120_v49 = vpop.f32.mrb[29].mxu1 }
 0x344   : > { %v2073_v15 = vadd.f32 %v2072_v48, %v2071_v23  ;;  %v2121_v27 = vadd.f32 %v2120_v49, %v2119_v9  ;;  %v2074_v51 = vpop.f32.mrb[30].mxu0  ;;  %v2122_v54 = vpop.f32.mrb[30].mxu1 }
 0x345   : > { %v2075_v52 = vpop.f32.mrb[31].mxu0  ;;  %v2123_v21 = vpop.f32.mrb[31].mxu1 }
 0x346   : > { %v1722_v32 = vadd.f32 %v2073_v15, %v2969_v13  ;;  %v1786_v56 = vadd.f32 %v2121_v27, %v2969_v13  ;;  %v2076_v57 = vadd.f32 %v2075_v52, %v2074_v51  ;;  %v2124_v29 = vadd.f32 %v2123_v21, %v2122_v54 }
 0x348   : > { %1806 = vst [vmem:[#allocation13 + $0x70] sm:$0xff] %v1722_v32  ;;  %1822 = vst [vmem:[#allocation13 + $0xf0] sm:$0xff] %v1786_v56  ;;  %v1725_v39 = vadd.f32 %v2076_v57, %v2969_v13  ;;  %v1789_v58 = vadd.f32 %v2124_v29, %v2969_v13 }
 0x34a   : > { %1807 = vst [vmem:[#allocation13 + $0x78] sm:$0xff] %v1725_v39  ;;  %1823 = vst [vmem:[#allocation13 + $0xf8] sm:$0xff] %v1789_v58 }
 0x34b PF: > { %p3005_p12 = scmp.eq.s32.totalorder %s1943_s24, 1  ;;  %s2475_s11 = smov [#allocation13]  }
 0x34c   : > { %s1839_s12 = sshll.u32 %s2475_s11, 4  ;;  %s1840_s12 = int_to_ptr.vmem [resolvable:$true] %s1839_s12 }
 0x34d   : > { %s2402_s13 = scalar_lea.vmem %s1840_s12, 4096  ;;  %s2408_s7 = scalar_lea.vmem %s1840_s12, 8192 }
 0x34e   : > { %p2403_p13 = scmp.ne.s32.totalorder %s1840_s12, %s2402_s13  ;;  %p2409_p2 = scmp.lt.s32.totalorder %s1840_s12, %s1840_s12 }
 0x34f   : > { %p2410_p5 = scmp.lt.s32.totalorder %s2408_s7, %s2402_s13 }
 0x350   : > { %p2404_p0 = pnand %p2403_p13, %p3005_p12 }
 0x351   : > { %p2411_p6 = por %p2410_p5, %p2409_p2 }
 0x352   : > { %p2405_p1 = pneg %p2404_p0 }
 0x354   : > { %p2412_p3 = pnand %p2411_p6, %p2405_p1 }
 0x356   : > { %2415 = shalt.err (!%p2412_p3)
}
 0x357   : > { %s2416_s14 = scalar_lea.hbm %s3046_s6, 4096 }
 0x358   : > { %p2417_p4 = scmp.ne.s32.totalorder %s3046_s6, %s2416_s14  ;;  %p2422_p9 = scmp.lt.u32.totalorder %s2416_s14, %s3046_s6 }
 0x35a   : > { %p2418_p7 = pnand %p2417_p4, %p3005_p12 }
 0x35c   : > { %p2419_p8 = pneg %p2418_p7 }
 0x35e   : > { %p2424_p10 = pnand %p2422_p9, %p2419_p8 }
 0x360   : > { %2427 = shalt.err (!%p2424_p10)
}
 0x361   : > { %s2476_s18 = smov 128   ;;  %s2477_s19 = smov 8  }
 0x362   : > { %2186 = dma.vmem_to_hbm [thread:$0]  (%p3005_p12), %s1840_s12, 4096, %s3046_s6, [#allocation9], %s2476_s18, %s2476_s18, %s2477_s19  }
 0x363 PF: > { %p2213_p11 = scmp.eq.s32.totalorder %s1944_s25, 1  ;;  %p3057_p13 = scmp.ge.s32.totalorder %s2462_s23, 2 }
 0x365   : > { %p2201_p0 = pnand %p2213_p11, %p3057_p13 }
 0x367   : > { %2449 = dma.done.wait (!%p2201_p0), [#allocation9], 4096  }
 0x368   : > { %2451 = vsyncadd (!%p2201_p0), [#allocation9], 4294963200  ;;  %s23_s23 = sadd.s32 1, %s2462_s23   ;;  %s3058_s21 = smov %s2458_s22 }
 0x369   : > { %p20_p1 = scmp.ge.s32.totalorder %s23_s23, 4   ;;  %s3059_s22 = smov %s3061_s26 }
 0x36b   :  { %22 = sbr.rel (!%p20_p1) target bundleno = 6 (0x6), region = 115 }
 0x372   :  { %1860 = vsyncpa [#allocation8], 1 }
 0x373   :  { %1862 = vsyncpa [#allocation8 + $0x1], 1 }
 0x374   :  { %1863 = vsyncpa [#allocation11], 1 }
 0x375   :  { %1864 = vsyncpa [#allocation9], 1 }
 0x376   :  { %1866 = vsyncpa [#allocation9 + $0x1], 1 }

</bundles_post_ra>
